<compile_context>
chip_gen: v5e
topology: v5e:2x2
jax: 0.10.0
libtpu: 0.0.40
codegen_flags: <defaults>
</compile_context>

<pallas_src>
import jax
import jax.numpy as jnp
from jax.experimental import pallas as pl
from jax.experimental.pallas import tpu as pltpu


def _round_up(n, m):
    return ((n + m - 1) // m) * m


def _cdiv(a, b):
    return -(-a // b)


def _pad_to(a, shape):
    pads = [(0, t - s) for s, t in zip(a.shape, shape)]
    return jnp.pad(a, pads)


def _vmem_capacity_bytes():
    """Physical per-core VMEM (generation-aware); safe fallback 128 MiB."""
    try:
        info = pltpu.get_tpu_info()
        cap = getattr(info, "vmem_capacity_bytes", None)
        if cap:
            return int(cap)
    except Exception:
        pass
    return 128 << 20


def _mxu_lane_multiple():
    """Best effort: 256 on 256-wide-MXU chips (v6e/v7x), else 128 (always safe)."""
    try:
        info = pltpu.get_tpu_info()
        for name in ("mxu_column_count", "mxu_contracting_size", "mxu_size"):
            v = getattr(info, name, None)
            if v:
                return 256 if int(v) >= 256 else 128
    except Exception:
        pass
    return 128


# ----------------------------------------------------------------------------
# Kernel
# ----------------------------------------------------------------------------
def _vae_kernel(
    x_ref, eps_ref,
    w_ei_ref, b_ei_ref,        # (XP, HP), (1, HP)
    w_h_ref, b_h_ref,          # (4, HP, HP), (4, 1, HP)  [e1, e2, d1, d2]
    w_mulv_ref, b_mulv_ref,    # (HP, 2*LP), (1, 2*LP)    fused mu || logvar
    w_di_ref, b_di_ref,        # (LP, HP), (1, HP)
    w_do_ref, b_do_ref,        # (HP, XP), (1, XP)
    xhat_ref, mulv_ref,
):
    wdt = w_ei_ref.dtype                      # bf16 (or f32) weight dtype
    LP = eps_ref.shape[-1]

    def dense(a, w, b):
        # `a` is already in the MXU weight dtype; f32 accumulation.
        return jnp.dot(a, w, preferred_element_type=jnp.float32) + b

    # ---------------- encoder ----------------
    h = dense(x_ref[...].astype(wdt), w_ei_ref[...], b_ei_ref[...]).astype(wdt)
    h = jnp.maximum(dense(h, w_h_ref[0], b_h_ref[0]), 0.0).astype(wdt)
    h = jnp.maximum(dense(h, w_h_ref[1], b_h_ref[1]), 0.0).astype(wdt)

    # Fused mu || logvar projection -> single lane-dense output slab (f32).
    mulv = dense(h, w_mulv_ref[...], b_mulv_ref[...])
    mulv_ref[...] = mulv
    mu = mulv[:, :LP]
    logvar = mulv[:, LP:]

    # ---------------- reparametrize ----------------
    z = (eps_ref[...].astype(jnp.float32) * jnp.exp(0.5 * logvar) + mu).astype(wdt)

    # ---------------- decoder ----------------
    h = dense(z, w_di_ref[...], b_di_ref[...]).astype(wdt)
    h = jnp.maximum(dense(h, w_h_ref[2], b_h_ref[2]), 0.0).astype(wdt)
    h = jnp.maximum(dense(h, w_h_ref[3], b_h_ref[3]), 0.0).astype(wdt)

    logits = dense(h, w_do_ref[...], b_do_ref[...])
    # Exact, numerically-safe sigmoid: for very negative logits exp(-x)->inf
    # and 1/(1+inf)->0 (no NaN).  Kernel is MXU/DMA bound; VALU divide is free.
    xhat_ref[...] = (1.0 / (1.0 + jnp.exp(-logits))).astype(xhat_ref.dtype)


# ----------------------------------------------------------------------------
# Host-side packing / wrapper
# ----------------------------------------------------------------------------
def pack_vae_params(p, x_dim, hidden_dim, latent_dim,
                    weight_dtype=jnp.bfloat16, mxu_pad=128):
    """Zero-pad feature dims to lane multiples (128, or 256 on 256-wide MXU
    chips when the dim exceeds 128), fuse mu|logvar, stack the four
    (hidden, hidden) layers, cast weights to `weight_dtype`."""
    def pad_dim(d):
        padded = _round_up(d, 128)
        if mxu_pad > 128 and padded > 128:
            padded = _round_up(d, mxu_pad)
        return padded

    XP = pad_dim(x_dim)
    HP = pad_dim(hidden_dim)
    LP = _round_up(latent_dim, 128)          # latent is tiny; keep 128
    wd = weight_dtype

    packed = {
        "w_ei": _pad_to(p["w_ei"], (XP, HP)).astype(wd),
        "b_ei": _pad_to(p["b_ei"], (1, HP)).astype(jnp.float32),
        "w_h": jnp.stack(
            [_pad_to(p[k], (HP, HP)) for k in ("w_e1", "w_e2", "w_d1", "w_d2")]
        ).astype(wd),
        "b_h": jnp.stack(
            [_pad_to(p[k], (1, HP)) for k in ("b_e1", "b_e2", "b_d1", "b_d2")]
        ).astype(jnp.float32),
        "w_mulv": jnp.concatenate(
            [_pad_to(p["w_mu"], (HP, LP)), _pad_to(p["w_lv"], (HP, LP))], axis=1
        ).astype(wd),
        "b_mulv": jnp.concatenate(
            [_pad_to(p["b_mu"], (1, LP)), _pad_to(p["b_lv"], (1, LP))], axis=1
        ).astype(jnp.float32),
        "w_di": _pad_to(p["w_di"], (LP, HP)).astype(wd),
        "b_di": _pad_to(p["b_di"], (1, HP)).astype(jnp.float32),
        "w_do": _pad_to(p["w_do"], (HP, XP)).astype(wd),
        "b_do": _pad_to(p["b_do"], (1, XP)).astype(jnp.float32),
    }
    return packed, (XP, HP, LP)


def vae_forward(x, eps, params, *, batch_tile=None,
                weight_dtype=jnp.bfloat16, xhat_dtype=jnp.float32):
    """Runs the VAE forward pass in one Pallas kernel, tiled over batch."""
    B, x_dim = x.shape
    latent_dim = eps.shape[1]
    hidden_dim = params["w_ei"].shape[1]

    packed, (XP, HP, LP) = pack_vae_params(
        params, x_dim, hidden_dim, latent_dim, weight_dtype, _mxu_lane_multiple())

    weight_order = ["w_ei", "b_ei", "w_h", "b_h",
                    "w_mulv", "b_mulv", "w_di", "b_di", "w_do", "b_do"]
    weight_args = [packed[k] for k in weight_order]
    weight_bytes = sum(int(a.size) * a.dtype.itemsize for a in weight_args)

    # ---- generation-aware VMEM cap -----------------------------------------
    vmem_cap = int(0.85 * _vmem_capacity_bytes())

    act_dtype = jnp.bfloat16 if weight_dtype == jnp.bfloat16 else jnp.float32
    abytes = jnp.dtype(act_dtype).itemsize

    def vmem_budget(bt, weight_buffers):
        # Live per-step footprint: double-buffered I/O tiles + all in-kernel
        # intermediates (f32 matmul acc, bf16 h, mulv, z, logits) + headroom.
        act = bt * (
            2 * XP * abytes + 2 * LP * abytes          # x, eps input tiles (x2)
            + 2 * XP * 4 + 2 * (2 * LP) * 4            # xhat, mu||logvar output tiles (x2)
            + HP * 4 + HP * abytes                     # f32 accumulator + bf16 h
            + (2 * LP) * 4 + LP * abytes + XP * 4      # mulv, z, logits
        )
        return weight_buffers * weight_bytes + int(1.5 * act) + (2 << 20)

    # ---- batch tiling: >= 4 steps (>= 2 per TC on v7x), even split ---------
    if batch_tile is None:
        if B >= 32:
            steps = max(4, _cdiv(B, 512))
        else:
            steps = max(1, min(4, B // 8))
        batch_tile = _round_up(_cdiv(B, steps), 8)
    batch_tile = max(8, _round_up(batch_tile, 8))
    # Shrink the tile until the (single-buffered-weight) budget fits the chip.
    while vmem_budget(batch_tile, 1) > vmem_cap and batch_tile > 8:
        batch_tile = max(8, _round_up(batch_tile // 2, 8))
    steps = _cdiv(B, batch_tile)
    Bp = steps * batch_tile

    # bf16 activation I/O: halves the dominant HBM streams; zero padding exact.
    x_p = _pad_to(x.astype(act_dtype), (Bp, XP))
    eps_p = _pad_to(eps.astype(act_dtype), (Bp, LP))

    def batch_spec(feat):
        return pl.BlockSpec((batch_tile, feat), lambda i: (i, 0))

    def run(weight_buffers):
        pipeline_mode = pl.Buffered(1) if weight_buffers == 1 else None

        def full_spec(arr):
            nd = arr.ndim
            kwargs = {}
            if pipeline_mode is not None:
                kwargs["pipeline_mode"] = pipeline_mode
            # Grid-invariant full-array block (constant index_map -> no re-DMA).
            return pl.BlockSpec(arr.shape, lambda i, _n=nd: (0,) * _n, **kwargs)

        in_specs = ([batch_spec(XP), batch_spec(LP)]
                    + [full_spec(w) for w in weight_args])
        out_specs = [batch_spec(XP), batch_spec(2 * LP)]
        out_shape = [
            jax.ShapeDtypeStruct((Bp, XP), xhat_dtype),        # x_hat (padded)
            jax.ShapeDtypeStruct((Bp, 2 * LP), jnp.float32),   # mu || logvar (padded)
        ]
        vmem_limit = int(min(vmem_cap,
                             max(vmem_budget(batch_tile, weight_buffers), 32 << 20)))
        fn = pl.pallas_call(
            _vae_kernel,
            out_shape=out_shape,
            grid_spec=pltpu.PrefetchScalarGridSpec(
                num_scalar_prefetch=0,
                grid=(Bp // batch_tile,),
                in_specs=in_specs,
                out_specs=out_specs,
            ),
            compiler_params=pltpu.CompilerParams(
                dimension_semantics=("parallel",),
                vmem_limit_bytes=vmem_limit,
            ),
        )
        out = fn(x_p, eps_p, *weight_args)
        jax.block_until_ready(out)
        return out

    try:
        xhat_p, mulv_p = run(1)       # single-buffered grid-invariant weights
    except Exception:
        # Fallback: this JAX build rejected pipeline_mode=Buffered(1) on a
        # top-level pallas_call BlockSpec -> use default double buffering.
        xhat_p, mulv_p = run(2)

    x_hat = xhat_p[:B, :x_dim]
    mu = mulv_p[:B, :latent_dim]
    logvar = mulv_p[:B, LP:LP + latent_dim]
    return x_hat, mu, logvar


# ----------------------------------------------------------------------------
# Params / reference
# ----------------------------------------------------------------------------
def init_vae_params(key, x_dim, hidden_dim, latent_dim):
    """Deterministic init mimicking PyTorch nn.Linear (U[-1/sqrt(fan_in), +])."""
    def linear(k, fan_in, fan_out):
        kw, kb = jax.random.split(k)
        bound = 1.0 / jnp.sqrt(fan_in)
        w = jax.random.uniform(kw, (fan_in, fan_out), jnp.float32, -bound, bound)
        b = jax.random.uniform(kb, (1, fan_out), jnp.float32, -bound, bound)
        return w, b

    keys = jax.random.split(key, 9)
    p = {}
    p["w_ei"], p["b_ei"] = linear(keys[0], x_dim, hidden_dim)
    p["w_e1"], p["b_e1"] = linear(keys[1], hidden_dim, hidden_dim)
    p["w_e2"], p["b_e2"] = linear(keys[2], hidden_dim, hidden_dim)
    p["w_mu"], p["b_mu"] = linear(keys[3], hidden_dim, latent_dim)
    p["w_lv"], p["b_lv"] = linear(keys[4], hidden_dim, latent_dim)
    p["w_di"], p["b_di"] = linear(keys[5], latent_dim, hidden_dim)
    p["w_d1"], p["b_d1"] = linear(keys[6], hidden_dim, hidden_dim)
    p["w_d2"], p["b_d2"] = linear(keys[7], hidden_dim, hidden_dim)
    p["w_do"], p["b_do"] = linear(keys[8], hidden_dim, x_dim)
    return p


def vae_forward_ref(x, eps, p, weight_dtype=jnp.bfloat16):
    """Pure-JAX reference mirroring the kernel math (bf16 MXU inputs / I/O,
    f32 accumulation, exact sigmoid)."""
    wd = weight_dtype

    def dense(a, w, b):
        return jnp.dot(a.astype(wd), w.astype(wd),
                       preferred_element_type=jnp.float32) + b

    x_in = x.astype(wd)
    eps_in = eps.astype(wd).astype(jnp.float32)

    h = dense(x_in, p["w_ei"], p["b_ei"])
    h = jax.nn.relu(dense(h, p["w_e1"], p["b_e1"]))
    h = jax.nn.relu(dense(h, p["w_e2"], p["b_e2"]))
    mu = dense(h, p["w_mu"], p["b_mu"])
    logvar = dense(h, p["w_lv"], p["b_lv"])
    z = eps_in * jnp.exp(0.5 * logvar) + mu
    h = dense(z, p["w_di"], p["b_di"])
    h = jax.nn.relu(dense(h, p["w_d1"], p["b_d1"]))
    h = jax.nn.relu(dense(h, p["w_d2"], p["b_d2"]))
    logits = dense(h, p["w_do"], p["b_do"])
    x_hat = 1.0 / (1.0 + jnp.exp(-logits))
    return x_hat, mu, logvar


if __name__ == "__main__":
    # Small shapes consistent with the module; B=16 -> 2 batch grid steps
    # (exercises the pipelined "parallel" batch axis).
    B, X_DIM, HIDDEN, LATENT = 16, 16, 32, 2

    root = jax.random.PRNGKey(0)
    k_params, k_x, k_eps = jax.random.split(root, 3)

    params = init_vae_params(k_params, X_DIM, HIDDEN, LATENT)
    x = jax.random.uniform(k_x, (B, X_DIM), jnp.float32)
    eps = jax.random.normal(k_eps, (B, LATENT), jnp.float32)

    x_hat, mu, logvar = vae_forward(x, eps, params)
    jax.block_until_ready((x_hat, mu, logvar))

    # Correctness check against a pure-JAX reference of the same math.
    x_hat_r, mu_r, logvar_r = vae_forward_ref(x, eps, params)
    assert x_hat.shape == (B, X_DIM) and mu.shape == (B, LATENT) and logvar.shape == (B, LATENT)
    assert bool(jnp.all(jnp.isfinite(x_hat)))
    assert jnp.allclose(mu, mu_r, atol=1e-4, rtol=1e-4)
    assert jnp.allclose(logvar, logvar_r, atol=1e-4, rtol=1e-4)
    assert jnp.allclose(x_hat, x_hat_r, atol=2e-3, rtol=2e-3)

    print("KERNEL_OK")
</pallas_src>

<mosaic_0001>
module attributes {stable_mosaic.version = 11 : i64} {
  func.func @_vae_kernel(%arg0: i32, %arg1: memref<8x128xbf16, #tpu.memory_space<vmem>>, %arg2: memref<8x128xbf16, #tpu.memory_space<vmem>>, %arg3: memref<128x128xbf16, #tpu.memory_space<vmem>>, %arg4: memref<1x128xf32, #tpu.memory_space<vmem>>, %arg5: memref<4x128x128xbf16, #tpu.memory_space<vmem>>, %arg6: memref<4x1x128xf32, #tpu.memory_space<vmem>>, %arg7: memref<128x256xbf16, #tpu.memory_space<vmem>>, %arg8: memref<1x256xf32, #tpu.memory_space<vmem>>, %arg9: memref<128x128xbf16, #tpu.memory_space<vmem>>, %arg10: memref<1x128xf32, #tpu.memory_space<vmem>>, %arg11: memref<128x128xbf16, #tpu.memory_space<vmem>>, %arg12: memref<1x128xf32, #tpu.memory_space<vmem>>, %arg13: memref<8x128xf32, #tpu.memory_space<vmem>>, %arg14: memref<8x256xf32, #tpu.memory_space<vmem>>) attributes {dimension_semantics = [#tpu.dimension_semantics<parallel>], iteration_bounds = array<i64: 2>, scalar_prefetch = 0 : i64, scratch_operands = 0 : i64, tpu.core_type = #tpu.core_type<tc>, window_params = [{transform_indices = @transform_0, window_bounds = array<i64: 8, 128>}, {transform_indices = @transform_1, window_bounds = array<i64: 8, 128>}, {pipeline_mode = #tpu.pipeline_mode<synchronous>, transform_indices = @transform_2, window_bounds = array<i64: 128, 128>}, {pipeline_mode = #tpu.pipeline_mode<synchronous>, transform_indices = @transform_3, window_bounds = array<i64: 1, 128>}, {pipeline_mode = #tpu.pipeline_mode<synchronous>, transform_indices = @transform_4, window_bounds = array<i64: 4, 128, 128>}, {pipeline_mode = #tpu.pipeline_mode<synchronous>, transform_indices = @transform_5, window_bounds = array<i64: 4, 1, 128>}, {pipeline_mode = #tpu.pipeline_mode<synchronous>, transform_indices = @transform_6, window_bounds = array<i64: 128, 256>}, {pipeline_mode = #tpu.pipeline_mode<synchronous>, transform_indices = @transform_7, window_bounds = array<i64: 1, 256>}, {pipeline_mode = #tpu.pipeline_mode<synchronous>, transform_indices = @transform_8, window_bounds = array<i64: 128, 128>}, {pipeline_mode = #tpu.pipeline_mode<synchronous>, transform_indices = @transform_9, window_bounds = array<i64: 1, 128>}, {pipeline_mode = #tpu.pipeline_mode<synchronous>, transform_indices = @transform_10, window_bounds = array<i64: 128, 128>}, {pipeline_mode = #tpu.pipeline_mode<synchronous>, transform_indices = @transform_11, window_bounds = array<i64: 1, 128>}, {transform_indices = @transform_12, window_bounds = array<i64: 8, 128>}, {transform_indices = @transform_13, window_bounds = array<i64: 8, 256>}]} {
    %c0 = arith.constant 0 : index
    %c0_0 = arith.constant 0 : index
    %0 = vector.load %arg1[%c0, %c0_0] : memref<8x128xbf16, #tpu.memory_space<vmem>>, vector<8x128xbf16>
    %c0_1 = arith.constant 0 : index
    %c0_2 = arith.constant 0 : index
    %1 = vector.load %arg3[%c0_1, %c0_2] : memref<128x128xbf16, #tpu.memory_space<vmem>>, vector<128x128xbf16>
    %c0_3 = arith.constant 0 : index
    %c0_4 = arith.constant 0 : index
    %2 = vector.load %arg4[%c0_3, %c0_4] : memref<1x128xf32, #tpu.memory_space<vmem>>, vector<1x128xf32>
    %cst = arith.constant dense<0.000000e+00> : vector<8x128xf32>
    %3 = tpu.matmul %0, %1, %cst {dimension_numbers = #tpu.dot_dimension_numbers<[1], [0], [0], [1], [0, 0, 1, 1], [], []>} : vector<8x128xbf16>, vector<128x128xbf16>, vector<8x128xf32> -> vector<8x128xf32>
    %4 = vector.broadcast %2 : vector<1x128xf32> to vector<8x128xf32>
    %5 = arith.addf %3, %4 : vector<8x128xf32>
    %6 = arith.truncf %5 : vector<8x128xf32> to vector<8x128xbf16>
    %c0_5 = arith.constant 0 : index
    %c0_6 = arith.constant 0 : index
    %c0_7 = arith.constant 0 : index
    %7 = vector.load %arg5[%c0_5, %c0_6, %c0_7] : memref<4x128x128xbf16, #tpu.memory_space<vmem>>, vector<1x128x128xbf16>
    %8 = vector.shape_cast %7 : vector<1x128x128xbf16> to vector<128x128xbf16>
    %c0_8 = arith.constant 0 : index
    %c0_9 = arith.constant 0 : index
    %c0_10 = arith.constant 0 : index
    %9 = vector.load %arg6[%c0_8, %c0_9, %c0_10] : memref<4x1x128xf32, #tpu.memory_space<vmem>>, vector<1x1x128xf32>
    %10 = vector.shape_cast %9 : vector<1x1x128xf32> to vector<1x128xf32>
    %cst_11 = arith.constant dense<0.000000e+00> : vector<8x128xf32>
    %11 = tpu.matmul %6, %8, %cst_11 {dimension_numbers = #tpu.dot_dimension_numbers<[1], [0], [0], [1], [0, 0, 1, 1], [], []>} : vector<8x128xbf16>, vector<128x128xbf16>, vector<8x128xf32> -> vector<8x128xf32>
    %12 = vector.broadcast %10 : vector<1x128xf32> to vector<8x128xf32>
    %13 = arith.addf %11, %12 : vector<8x128xf32>
    %cst_12 = arith.constant 0.000000e+00 : f32
    %14 = vector.broadcast %cst_12 : f32 to vector<8x128xf32>
    %15 = arith.maximumf %13, %14 : vector<8x128xf32>
    %16 = arith.truncf %15 : vector<8x128xf32> to vector<8x128xbf16>
    %c1 = arith.constant 1 : index
    %c0_13 = arith.constant 0 : index
    %c0_14 = arith.constant 0 : index
    %17 = vector.load %arg5[%c1, %c0_13, %c0_14] : memref<4x128x128xbf16, #tpu.memory_space<vmem>>, vector<1x128x128xbf16>
    %18 = vector.shape_cast %17 : vector<1x128x128xbf16> to vector<128x128xbf16>
    %c1_15 = arith.constant 1 : index
    %c0_16 = arith.constant 0 : index
    %c0_17 = arith.constant 0 : index
    %19 = vector.load %arg6[%c1_15, %c0_16, %c0_17] : memref<4x1x128xf32, #tpu.memory_space<vmem>>, vector<1x1x128xf32>
    %20 = vector.shape_cast %19 : vector<1x1x128xf32> to vector<1x128xf32>
    %cst_18 = arith.constant dense<0.000000e+00> : vector<8x128xf32>
    %21 = tpu.matmul %16, %18, %cst_18 {dimension_numbers = #tpu.dot_dimension_numbers<[1], [0], [0], [1], [0, 0, 1, 1], [], []>} : vector<8x128xbf16>, vector<128x128xbf16>, vector<8x128xf32> -> vector<8x128xf32>
    %22 = vector.broadcast %20 : vector<1x128xf32> to vector<8x128xf32>
    %23 = arith.addf %21, %22 : vector<8x128xf32>
    %cst_19 = arith.constant 0.000000e+00 : f32
    %24 = vector.broadcast %cst_19 : f32 to vector<8x128xf32>
    %25 = arith.maximumf %23, %24 : vector<8x128xf32>
    %26 = arith.truncf %25 : vector<8x128xf32> to vector<8x128xbf16>
    %c0_20 = arith.constant 0 : index
    %c0_21 = arith.constant 0 : index
    %27 = vector.load %arg7[%c0_20, %c0_21] : memref<128x256xbf16, #tpu.memory_space<vmem>>, vector<128x256xbf16>
    %c0_22 = arith.constant 0 : index
    %c0_23 = arith.constant 0 : index
    %28 = vector.load %arg8[%c0_22, %c0_23] : memref<1x256xf32, #tpu.memory_space<vmem>>, vector<1x256xf32>
    %cst_24 = arith.constant dense<0.000000e+00> : vector<8x256xf32>
    %29 = tpu.matmul %26, %27, %cst_24 {dimension_numbers = #tpu.dot_dimension_numbers<[1], [0], [0], [1], [0, 0, 1, 1], [], []>} : vector<8x128xbf16>, vector<128x256xbf16>, vector<8x256xf32> -> vector<8x256xf32>
    %30 = vector.broadcast %28 : vector<1x256xf32> to vector<8x256xf32>
    %31 = arith.addf %29, %30 : vector<8x256xf32>
    %c0_25 = arith.constant 0 : index
    %c0_26 = arith.constant 0 : index
    %32 = vector.load %arg14[%c0_25, %c0_26] : memref<8x256xf32, #tpu.memory_space<vmem>>, vector<8x256xf32>
    tpu.vector_store %arg14[%c0_25, %c0_26], %31 {strides = array<i32>} : memref<8x256xf32, #tpu.memory_space<vmem>>, vector<8x256xf32>,
    %33 = vector.extract_strided_slice %31 {offsets = [0, 0], sizes = [8, 128], strides = [1, 1]} : vector<8x256xf32> to vector<8x128xf32>
    %34 = vector.extract_strided_slice %31 {offsets = [0, 128], sizes = [8, 128], strides = [1, 1]} : vector<8x256xf32> to vector<8x128xf32>
    %c0_27 = arith.constant 0 : index
    %c0_28 = arith.constant 0 : index
    %35 = vector.load %arg2[%c0_27, %c0_28] : memref<8x128xbf16, #tpu.memory_space<vmem>>, vector<8x128xbf16>
    %36 = arith.extf %35 : vector<8x128xbf16> to vector<8x128xf32>
    %cst_29 = arith.constant 5.000000e-01 : f32
    %37 = vector.broadcast %cst_29 : f32 to vector<8x128xf32>
    %38 = arith.mulf %37, %34 : vector<8x128xf32>
    %39 = math.exp %38 : vector<8x128xf32>
    %40 = arith.mulf %36, %39 : vector<8x128xf32>
    %41 = arith.addf %40, %33 : vector<8x128xf32>
    %42 = arith.truncf %41 : vector<8x128xf32> to vector<8x128xbf16>
    %c0_30 = arith.constant 0 : index
    %c0_31 = arith.constant 0 : index
    %43 = vector.load %arg9[%c0_30, %c0_31] : memref<128x128xbf16, #tpu.memory_space<vmem>>, vector<128x128xbf16>
    %c0_32 = arith.constant 0 : index
    %c0_33 = arith.constant 0 : index
    %44 = vector.load %arg10[%c0_32, %c0_33] : memref<1x128xf32, #tpu.memory_space<vmem>>, vector<1x128xf32>
    %cst_34 = arith.constant dense<0.000000e+00> : vector<8x128xf32>
    %45 = tpu.matmul %42, %43, %cst_34 {dimension_numbers = #tpu.dot_dimension_numbers<[1], [0], [0], [1], [0, 0, 1, 1], [], []>} : vector<8x128xbf16>, vector<128x128xbf16>, vector<8x128xf32> -> vector<8x128xf32>
    %46 = vector.broadcast %44 : vector<1x128xf32> to vector<8x128xf32>
    %47 = arith.addf %45, %46 : vector<8x128xf32>
    %48 = arith.truncf %47 : vector<8x128xf32> to vector<8x128xbf16>
    %c2 = arith.constant 2 : index
    %c0_35 = arith.constant 0 : index
    %c0_36 = arith.constant 0 : index
    %49 = vector.load %arg5[%c2, %c0_35, %c0_36] : memref<4x128x128xbf16, #tpu.memory_space<vmem>>, vector<1x128x128xbf16>
    %50 = vector.shape_cast %49 : vector<1x128x128xbf16> to vector<128x128xbf16>
    %c2_37 = arith.constant 2 : index
    %c0_38 = arith.constant 0 : index
    %c0_39 = arith.constant 0 : index
    %51 = vector.load %arg6[%c2_37, %c0_38, %c0_39] : memref<4x1x128xf32, #tpu.memory_space<vmem>>, vector<1x1x128xf32>
    %52 = vector.shape_cast %51 : vector<1x1x128xf32> to vector<1x128xf32>
    %cst_40 = arith.constant dense<0.000000e+00> : vector<8x128xf32>
    %53 = tpu.matmul %48, %50, %cst_40 {dimension_numbers = #tpu.dot_dimension_numbers<[1], [0], [0], [1], [0, 0, 1, 1], [], []>} : vector<8x128xbf16>, vector<128x128xbf16>, vector<8x128xf32> -> vector<8x128xf32>
    %54 = vector.broadcast %52 : vector<1x128xf32> to vector<8x128xf32>
    %55 = arith.addf %53, %54 : vector<8x128xf32>
    %cst_41 = arith.constant 0.000000e+00 : f32
    %56 = vector.broadcast %cst_41 : f32 to vector<8x128xf32>
    %57 = arith.maximumf %55, %56 : vector<8x128xf32>
    %58 = arith.truncf %57 : vector<8x128xf32> to vector<8x128xbf16>
    %c3 = arith.constant 3 : index
    %c0_42 = arith.constant 0 : index
    %c0_43 = arith.constant 0 : index
    %59 = vector.load %arg5[%c3, %c0_42, %c0_43] : memref<4x128x128xbf16, #tpu.memory_space<vmem>>, vector<1x128x128xbf16>
    %60 = vector.shape_cast %59 : vector<1x128x128xbf16> to vector<128x128xbf16>
    %c3_44 = arith.constant 3 : index
    %c0_45 = arith.constant 0 : index
    %c0_46 = arith.constant 0 : index
    %61 = vector.load %arg6[%c3_44, %c0_45, %c0_46] : memref<4x1x128xf32, #tpu.memory_space<vmem>>, vector<1x1x128xf32>
    %62 = vector.shape_cast %61 : vector<1x1x128xf32> to vector<1x128xf32>
    %cst_47 = arith.constant dense<0.000000e+00> : vector<8x128xf32>
    %63 = tpu.matmul %58, %60, %cst_47 {dimension_numbers = #tpu.dot_dimension_numbers<[1], [0], [0], [1], [0, 0, 1, 1], [], []>} : vector<8x128xbf16>, vector<128x128xbf16>, vector<8x128xf32> -> vector<8x128xf32>
    %64 = vector.broadcast %62 : vector<1x128xf32> to vector<8x128xf32>
    %65 = arith.addf %63, %64 : vector<8x128xf32>
    %cst_48 = arith.constant 0.000000e+00 : f32
    %66 = vector.broadcast %cst_48 : f32 to vector<8x128xf32>
    %67 = arith.maximumf %65, %66 : vector<8x128xf32>
    %68 = arith.truncf %67 : vector<8x128xf32> to vector<8x128xbf16>
    %c0_49 = arith.constant 0 : index
    %c0_50 = arith.constant 0 : index
    %69 = vector.load %arg11[%c0_49, %c0_50] : memref<128x128xbf16, #tpu.memory_space<vmem>>, vector<128x128xbf16>
    %c0_51 = arith.constant 0 : index
    %c0_52 = arith.constant 0 : index
    %70 = vector.load %arg12[%c0_51, %c0_52] : memref<1x128xf32, #tpu.memory_space<vmem>>, vector<1x128xf32>
    %cst_53 = arith.constant dense<0.000000e+00> : vector<8x128xf32>
    %71 = tpu.matmul %68, %69, %cst_53 {dimension_numbers = #tpu.dot_dimension_numbers<[1], [0], [0], [1], [0, 0, 1, 1], [], []>} : vector<8x128xbf16>, vector<128x128xbf16>, vector<8x128xf32> -> vector<8x128xf32>
    %72 = vector.broadcast %70 : vector<1x128xf32> to vector<8x128xf32>
    %73 = arith.addf %71, %72 : vector<8x128xf32>
    %cst_54 = arith.constant 0.000000e+00 : f32
    %74 = vector.broadcast %cst_54 : f32 to vector<8x128xf32>
    %75 = arith.subf %74, %73 : vector<8x128xf32>
    %76 = math.exp %75 : vector<8x128xf32>
    %cst_55 = arith.constant 1.000000e+00 : f32
    %77 = vector.broadcast %cst_55 : f32 to vector<8x128xf32>
    %78 = arith.addf %77, %76 : vector<8x128xf32>
    %cst_56 = arith.constant 1.000000e+00 : f32
    %79 = vector.broadcast %cst_56 : f32 to vector<8x128xf32>
    %80 = arith.divf %79, %78 : vector<8x128xf32>
    %c0_57 = arith.constant 0 : index
    %c0_58 = arith.constant 0 : index
    %81 = vector.load %arg13[%c0_57, %c0_58] : memref<8x128xf32, #tpu.memory_space<vmem>>, vector<8x128xf32>
    tpu.vector_store %arg13[%c0_57, %c0_58], %80 {strides = array<i32>} : memref<8x128xf32, #tpu.memory_space<vmem>>, vector<8x128xf32>,
    return
  }
  func.func @transform_0(%arg0: i32) -> (i32, i32) {
    %c0_i32 = arith.constant 0 : i32
    %c0_i32_0 = arith.constant 0 : i32
    return %arg0, %c0_i32 : i32, i32
  }
  func.func @transform_1(%arg0: i32) -> (i32, i32) {
    %c0_i32 = arith.constant 0 : i32
    %c0_i32_0 = arith.constant 0 : i32
    return %arg0, %c0_i32 : i32, i32
  }
  func.func @transform_2(%arg0: i32) -> (i32, i32) {
    %c0_i32 = arith.constant 0 : i32
    %c0_i32_0 = arith.constant 0 : i32
    %c0_i32_1 = arith.constant 0 : i32
    return %c0_i32, %c0_i32_0 : i32, i32
  }
  func.func @transform_3(%arg0: i32) -> (i32, i32) {
    %c0_i32 = arith.constant 0 : i32
    %c0_i32_0 = arith.constant 0 : i32
    %c0_i32_1 = arith.constant 0 : i32
    return %c0_i32, %c0_i32_0 : i32, i32
  }
  func.func @transform_4(%arg0: i32) -> (i32, i32, i32) {
    %c0_i32 = arith.constant 0 : i32
    %c0_i32_0 = arith.constant 0 : i32
    %c0_i32_1 = arith.constant 0 : i32
    %c0_i32_2 = arith.constant 0 : i32
    return %c0_i32, %c0_i32_0, %c0_i32_1 : i32, i32, i32
  }
  func.func @transform_5(%arg0: i32) -> (i32, i32, i32) {
    %c0_i32 = arith.constant 0 : i32
    %c0_i32_0 = arith.constant 0 : i32
    %c0_i32_1 = arith.constant 0 : i32
    %c0_i32_2 = arith.constant 0 : i32
    return %c0_i32, %c0_i32_0, %c0_i32_1 : i32, i32, i32
  }
  func.func @transform_6(%arg0: i32) -> (i32, i32) {
    %c0_i32 = arith.constant 0 : i32
    %c0_i32_0 = arith.constant 0 : i32
    %c0_i32_1 = arith.constant 0 : i32
    return %c0_i32, %c0_i32_0 : i32, i32
  }
  func.func @transform_7(%arg0: i32) -> (i32, i32) {
    %c0_i32 = arith.constant 0 : i32
    %c0_i32_0 = arith.constant 0 : i32
    %c0_i32_1 = arith.constant 0 : i32
    return %c0_i32, %c0_i32_0 : i32, i32
  }
  func.func @transform_8(%arg0: i32) -> (i32, i32) {
    %c0_i32 = arith.constant 0 : i32
    %c0_i32_0 = arith.constant 0 : i32
    %c0_i32_1 = arith.constant 0 : i32
    return %c0_i32, %c0_i32_0 : i32, i32
  }
  func.func @transform_9(%arg0: i32) -> (i32, i32) {
    %c0_i32 = arith.constant 0 : i32
    %c0_i32_0 = arith.constant 0 : i32
    %c0_i32_1 = arith.constant 0 : i32
    return %c0_i32, %c0_i32_0 : i32, i32
  }
  func.func @transform_10(%arg0: i32) -> (i32, i32) {
    %c0_i32 = arith.constant 0 : i32
    %c0_i32_0 = arith.constant 0 : i32
    %c0_i32_1 = arith.constant 0 : i32
    return %c0_i32, %c0_i32_0 : i32, i32
  }
  func.func @transform_11(%arg0: i32) -> (i32, i32) {
    %c0_i32 = arith.constant 0 : i32
    %c0_i32_0 = arith.constant 0 : i32
    %c0_i32_1 = arith.constant 0 : i32
    return %c0_i32, %c0_i32_0 : i32, i32
  }
  func.func @transform_12(%arg0: i32) -> (i32, i32) {
    %c0_i32 = arith.constant 0 : i32
    %c0_i32_0 = arith.constant 0 : i32
    return %arg0, %c0_i32 : i32, i32
  }
  func.func @transform_13(%arg0: i32) -> (i32, i32) {
    %c0_i32 = arith.constant 0 : i32
    %c0_i32_0 = arith.constant 0 : i32
    return %arg0, %c0_i32 : i32, i32
  }
}

module attributes {stable_mosaic.version = 11 : i64} {
  func.func @_vae_kernel(%arg0: i32, %arg1: memref<8x128xbf16, #tpu.memory_space<vmem>>, %arg2: memref<8x128xbf16, #tpu.memory_space<vmem>>, %arg3: memref<128x128xbf16, #tpu.memory_space<vmem>>, %arg4: memref<1x128xf32, #tpu.memory_space<vmem>>, %arg5: memref<4x128x128xbf16, #tpu.memory_space<vmem>>, %arg6: memref<4x1x128xf32, #tpu.memory_space<vmem>>, %arg7: memref<128x256xbf16, #tpu.memory_space<vmem>>, %arg8: memref<1x256xf32, #tpu.memory_space<vmem>>, %arg9: memref<128x128xbf16, #tpu.memory_space<vmem>>, %arg10: memref<1x128xf32, #tpu.memory_space<vmem>>, %arg11: memref<128x128xbf16, #tpu.memory_space<vmem>>, %arg12: memref<1x128xf32, #tpu.memory_space<vmem>>, %arg13: memref<8x128xf32, #tpu.memory_space<vmem>>, %arg14: memref<8x256xf32, #tpu.memory_space<vmem>>) attributes {dimension_semantics = [#tpu.dimension_semantics<parallel>], iteration_bounds = array<i64: 2>, scalar_prefetch = 0 : i64, scratch_operands = 0 : i64, tpu.core_type = #tpu.core_type<tc>, window_params = [{transform_indices = @transform_0, window_bounds = array<i64: 8, 128>}, {transform_indices = @transform_1, window_bounds = array<i64: 8, 128>}, {pipeline_mode = #tpu.pipeline_mode<synchronous>, transform_indices = @transform_2, window_bounds = array<i64: 128, 128>}, {pipeline_mode = #tpu.pipeline_mode<synchronous>, transform_indices = @transform_3, window_bounds = array<i64: 1, 128>}, {pipeline_mode = #tpu.pipeline_mode<synchronous>, transform_indices = @transform_4, window_bounds = array<i64: 4, 128, 128>}, {pipeline_mode = #tpu.pipeline_mode<synchronous>, transform_indices = @transform_5, window_bounds = array<i64: 4, 1, 128>}, {pipeline_mode = #tpu.pipeline_mode<synchronous>, transform_indices = @transform_6, window_bounds = array<i64: 128, 256>}, {pipeline_mode = #tpu.pipeline_mode<synchronous>, transform_indices = @transform_7, window_bounds = array<i64: 1, 256>}, {pipeline_mode = #tpu.pipeline_mode<synchronous>, transform_indices = @transform_8, window_bounds = array<i64: 128, 128>}, {pipeline_mode = #tpu.pipeline_mode<synchronous>, transform_indices = @transform_9, window_bounds = array<i64: 1, 128>}, {pipeline_mode = #tpu.pipeline_mode<synchronous>, transform_indices = @transform_10, window_bounds = array<i64: 128, 128>}, {pipeline_mode = #tpu.pipeline_mode<synchronous>, transform_indices = @transform_11, window_bounds = array<i64: 1, 128>}, {transform_indices = @transform_12, window_bounds = array<i64: 8, 128>}, {transform_indices = @transform_13, window_bounds = array<i64: 8, 256>}]} {
    %c0 = arith.constant 0 : index
    %c0_0 = arith.constant 0 : index
    %0 = vector.load %arg1[%c0, %c0_0] : memref<8x128xbf16, #tpu.memory_space<vmem>>, vector<8x128xbf16>
    %c0_1 = arith.constant 0 : index
    %c0_2 = arith.constant 0 : index
    %1 = vector.load %arg3[%c0_1, %c0_2] : memref<128x128xbf16, #tpu.memory_space<vmem>>, vector<128x128xbf16>
    %c0_3 = arith.constant 0 : index
    %c0_4 = arith.constant 0 : index
    %2 = vector.load %arg4[%c0_3, %c0_4] : memref<1x128xf32, #tpu.memory_space<vmem>>, vector<1x128xf32>
    %cst = arith.constant dense<0.000000e+00> : vector<8x128xf32>
    %3 = tpu.matmul %0, %1, %cst {dimension_numbers = #tpu.dot_dimension_numbers<[1], [0], [0], [1], [0, 0, 1, 1], [], []>} : vector<8x128xbf16>, vector<128x128xbf16>, vector<8x128xf32> -> vector<8x128xf32>
    %4 = vector.broadcast %2 : vector<1x128xf32> to vector<8x128xf32>
    %5 = arith.addf %3, %4 : vector<8x128xf32>
    %6 = arith.truncf %5 : vector<8x128xf32> to vector<8x128xbf16>
    %c0_5 = arith.constant 0 : index
    %c0_6 = arith.constant 0 : index
    %c0_7 = arith.constant 0 : index
    %7 = vector.load %arg5[%c0_5, %c0_6, %c0_7] : memref<4x128x128xbf16, #tpu.memory_space<vmem>>, vector<1x128x128xbf16>
    %8 = vector.shape_cast %7 : vector<1x128x128xbf16> to vector<128x128xbf16>
    %c0_8 = arith.constant 0 : index
    %c0_9 = arith.constant 0 : index
    %c0_10 = arith.constant 0 : index
    %9 = vector.load %arg6[%c0_8, %c0_9, %c0_10] : memref<4x1x128xf32, #tpu.memory_space<vmem>>, vector<1x1x128xf32>
    %10 = vector.shape_cast %9 : vector<1x1x128xf32> to vector<1x128xf32>
    %cst_11 = arith.constant dense<0.000000e+00> : vector<8x128xf32>
    %11 = tpu.matmul %6, %8, %cst_11 {dimension_numbers = #tpu.dot_dimension_numbers<[1], [0], [0], [1], [0, 0, 1, 1], [], []>} : vector<8x128xbf16>, vector<128x128xbf16>, vector<8x128xf32> -> vector<8x128xf32>
    %12 = vector.broadcast %10 : vector<1x128xf32> to vector<8x128xf32>
    %13 = arith.addf %11, %12 : vector<8x128xf32>
    %cst_12 = arith.constant 0.000000e+00 : f32
    %14 = vector.broadcast %cst_12 : f32 to vector<8x128xf32>
    %15 = arith.maximumf %13, %14 : vector<8x128xf32>
    %16 = arith.truncf %15 : vector<8x128xf32> to vector<8x128xbf16>
    %c1 = arith.constant 1 : index
    %c0_13 = arith.constant 0 : index
    %c0_14 = arith.constant 0 : index
    %17 = vector.load %arg5[%c1, %c0_13, %c0_14] : memref<4x128x128xbf16, #tpu.memory_space<vmem>>, vector<1x128x128xbf16>
    %18 = vector.shape_cast %17 : vector<1x128x128xbf16> to vector<128x128xbf16>
    %c1_15 = arith.constant 1 : index
    %c0_16 = arith.constant 0 : index
    %c0_17 = arith.constant 0 : index
    %19 = vector.load %arg6[%c1_15, %c0_16, %c0_17] : memref<4x1x128xf32, #tpu.memory_space<vmem>>, vector<1x1x128xf32>
    %20 = vector.shape_cast %19 : vector<1x1x128xf32> to vector<1x128xf32>
    %cst_18 = arith.constant dense<0.000000e+00> : vector<8x128xf32>
    %21 = tpu.matmul %16, %18, %cst_18 {dimension_numbers = #tpu.dot_dimension_numbers<[1], [0], [0], [1], [0, 0, 1, 1], [], []>} : vector<8x128xbf16>, vector<128x128xbf16>, vector<8x128xf32> -> vector<8x128xf32>
    %22 = vector.broadcast %20 : vector<1x128xf32> to vector<8x128xf32>
    %23 = arith.addf %21, %22 : vector<8x128xf32>
    %cst_19 = arith.constant 0.000000e+00 : f32
    %24 = vector.broadcast %cst_19 : f32 to vector<8x128xf32>
    %25 = arith.maximumf %23, %24 : vector<8x128xf32>
    %26 = arith.truncf %25 : vector<8x128xf32> to vector<8x128xbf16>
    %c0_20 = arith.constant 0 : index
    %c0_21 = arith.constant 0 : index
    %27 = vector.load %arg7[%c0_20, %c0_21] : memref<128x256xbf16, #tpu.memory_space<vmem>>, vector<128x256xbf16>
    %c0_22 = arith.constant 0 : index
    %c0_23 = arith.constant 0 : index
    %28 = vector.load %arg8[%c0_22, %c0_23] : memref<1x256xf32, #tpu.memory_space<vmem>>, vector<1x256xf32>
    %cst_24 = arith.constant dense<0.000000e+00> : vector<8x256xf32>
    %29 = tpu.matmul %26, %27, %cst_24 {dimension_numbers = #tpu.dot_dimension_numbers<[1], [0], [0], [1], [0, 0, 1, 1], [], []>} : vector<8x128xbf16>, vector<128x256xbf16>, vector<8x256xf32> -> vector<8x256xf32>
    %30 = vector.broadcast %28 : vector<1x256xf32> to vector<8x256xf32>
    %31 = arith.addf %29, %30 : vector<8x256xf32>
    %c0_25 = arith.constant 0 : index
    %c0_26 = arith.constant 0 : index
    %32 = vector.load %arg14[%c0_25, %c0_26] : memref<8x256xf32, #tpu.memory_space<vmem>>, vector<8x256xf32>
    tpu.vector_store %arg14[%c0_25, %c0_26], %31 {strides = array<i32>} : memref<8x256xf32, #tpu.memory_space<vmem>>, vector<8x256xf32>,
    %33 = vector.extract_strided_slice %31 {offsets = [0, 0], sizes = [8, 128], strides = [1, 1]} : vector<8x256xf32> to vector<8x128xf32>
    %34 = vector.extract_strided_slice %31 {offsets = [0, 128], sizes = [8, 128], strides = [1, 1]} : vector<8x256xf32> to vector<8x128xf32>
    %c0_27 = arith.constant 0 : index
    %c0_28 = arith.constant 0 : index
    %35 = vector.load %arg2[%c0_27, %c0_28] : memref<8x128xbf16, #tpu.memory_space<vmem>>, vector<8x128xbf16>
    %36 = arith.extf %35 : vector<8x128xbf16> to vector<8x128xf32>
    %cst_29 = arith.constant 5.000000e-01 : f32
    %37 = vector.broadcast %cst_29 : f32 to vector<8x128xf32>
    %38 = arith.mulf %37, %34 : vector<8x128xf32>
    %39 = math.exp %38 : vector<8x128xf32>
    %40 = arith.mulf %36, %39 : vector<8x128xf32>
    %41 = arith.addf %40, %33 : vector<8x128xf32>
    %42 = arith.truncf %41 : vector<8x128xf32> to vector<8x128xbf16>
    %c0_30 = arith.constant 0 : index
    %c0_31 = arith.constant 0 : index
    %43 = vector.load %arg9[%c0_30, %c0_31] : memref<128x128xbf16, #tpu.memory_space<vmem>>, vector<128x128xbf16>
    %c0_32 = arith.constant 0 : index
    %c0_33 = arith.constant 0 : index
    %44 = vector.load %arg10[%c0_32, %c0_33] : memref<1x128xf32, #tpu.memory_space<vmem>>, vector<1x128xf32>
    %cst_34 = arith.constant dense<0.000000e+00> : vector<8x128xf32>
    %45 = tpu.matmul %42, %43, %cst_34 {dimension_numbers = #tpu.dot_dimension_numbers<[1], [0], [0], [1], [0, 0, 1, 1], [], []>} : vector<8x128xbf16>, vector<128x128xbf16>, vector<8x128xf32> -> vector<8x128xf32>
    %46 = vector.broadcast %44 : vector<1x128xf32> to vector<8x128xf32>
    %47 = arith.addf %45, %46 : vector<8x128xf32>
    %48 = arith.truncf %47 : vector<8x128xf32> to vector<8x128xbf16>
    %c2 = arith.constant 2 : index
    %c0_35 = arith.constant 0 : index
    %c0_36 = arith.constant 0 : index
    %49 = vector.load %arg5[%c2, %c0_35, %c0_36] : memref<4x128x128xbf16, #tpu.memory_space<vmem>>, vector<1x128x128xbf16>
    %50 = vector.shape_cast %49 : vector<1x128x128xbf16> to vector<128x128xbf16>
    %c2_37 = arith.constant 2 : index
    %c0_38 = arith.constant 0 : index
    %c0_39 = arith.constant 0 : index
    %51 = vector.load %arg6[%c2_37, %c0_38, %c0_39] : memref<4x1x128xf32, #tpu.memory_space<vmem>>, vector<1x1x128xf32>
    %52 = vector.shape_cast %51 : vector<1x1x128xf32> to vector<1x128xf32>
    %cst_40 = arith.constant dense<0.000000e+00> : vector<8x128xf32>
    %53 = tpu.matmul %48, %50, %cst_40 {dimension_numbers = #tpu.dot_dimension_numbers<[1], [0], [0], [1], [0, 0, 1, 1], [], []>} : vector<8x128xbf16>, vector<128x128xbf16>, vector<8x128xf32> -> vector<8x128xf32>
    %54 = vector.broadcast %52 : vector<1x128xf32> to vector<8x128xf32>
    %55 = arith.addf %53, %54 : vector<8x128xf32>
    %cst_41 = arith.constant 0.000000e+00 : f32
    %56 = vector.broadcast %cst_41 : f32 to vector<8x128xf32>
    %57 = arith.maximumf %55, %56 : vector<8x128xf32>
    %58 = arith.truncf %57 : vector<8x128xf32> to vector<8x128xbf16>
    %c3 = arith.constant 3 : index
    %c0_42 = arith.constant 0 : index
    %c0_43 = arith.constant 0 : index
    %59 = vector.load %arg5[%c3, %c0_42, %c0_43] : memref<4x128x128xbf16, #tpu.memory_space<vmem>>, vector<1x128x128xbf16>
    %60 = vector.shape_cast %59 : vector<1x128x128xbf16> to vector<128x128xbf16>
    %c3_44 = arith.constant 3 : index
    %c0_45 = arith.constant 0 : index
    %c0_46 = arith.constant 0 : index
    %61 = vector.load %arg6[%c3_44, %c0_45, %c0_46] : memref<4x1x128xf32, #tpu.memory_space<vmem>>, vector<1x1x128xf32>
    %62 = vector.shape_cast %61 : vector<1x1x128xf32> to vector<1x128xf32>
    %cst_47 = arith.constant dense<0.000000e+00> : vector<8x128xf32>
    %63 = tpu.matmul %58, %60, %cst_47 {dimension_numbers = #tpu.dot_dimension_numbers<[1], [0], [0], [1], [0, 0, 1, 1], [], []>} : vector<8x128xbf16>, vector<128x128xbf16>, vector<8x128xf32> -> vector<8x128xf32>
    %64 = vector.broadcast %62 : vector<1x128xf32> to vector<8x128xf32>
    %65 = arith.addf %63, %64 : vector<8x128xf32>
    %cst_48 = arith.constant 0.000000e+00 : f32
    %66 = vector.broadcast %cst_48 : f32 to vector<8x128xf32>
    %67 = arith.maximumf %65, %66 : vector<8x128xf32>
    %68 = arith.truncf %67 : vector<8x128xf32> to vector<8x128xbf16>
    %c0_49 = arith.constant 0 : index
    %c0_50 = arith.constant 0 : index
    %69 = vector.load %arg11[%c0_49, %c0_50] : memref<128x128xbf16, #tpu.memory_space<vmem>>, vector<128x128xbf16>
    %c0_51 = arith.constant 0 : index
    %c0_52 = arith.constant 0 : index
    %70 = vector.load %arg12[%c0_51, %c0_52] : memref<1x128xf32, #tpu.memory_space<vmem>>, vector<1x128xf32>
    %cst_53 = arith.constant dense<0.000000e+00> : vector<8x128xf32>
    %71 = tpu.matmul %68, %69, %cst_53 {dimension_numbers = #tpu.dot_dimension_numbers<[1], [0], [0], [1], [0, 0, 1, 1], [], []>} : vector<8x128xbf16>, vector<128x128xbf16>, vector<8x128xf32> -> vector<8x128xf32>
    %72 = vector.broadcast %70 : vector<1x128xf32> to vector<8x128xf32>
    %73 = arith.addf %71, %72 : vector<8x128xf32>
    %cst_54 = arith.constant 0.000000e+00 : f32
    %74 = vector.broadcast %cst_54 : f32 to vector<8x128xf32>
    %75 = arith.subf %74, %73 : vector<8x128xf32>
    %76 = math.exp %75 : vector<8x128xf32>
    %cst_55 = arith.constant 1.000000e+00 : f32
    %77 = vector.broadcast %cst_55 : f32 to vector<8x128xf32>
    %78 = arith.addf %77, %76 : vector<8x128xf32>
    %cst_56 = arith.constant 1.000000e+00 : f32
    %79 = vector.broadcast %cst_56 : f32 to vector<8x128xf32>
    %80 = arith.divf %79, %78 : vector<8x128xf32>
    %c0_57 = arith.constant 0 : index
    %c0_58 = arith.constant 0 : index
    %81 = vector.load %arg13[%c0_57, %c0_58] : memref<8x128xf32, #tpu.memory_space<vmem>>, vector<8x128xf32>
    tpu.vector_store %arg13[%c0_57, %c0_58], %80 {strides = array<i32>} : memref<8x128xf32, #tpu.memory_space<vmem>>, vector<8x128xf32>,
    return
  }
  func.func @transform_0(%arg0: i32) -> (i32, i32) {
    %c0_i32 = arith.constant 0 : i32
    %c0_i32_0 = arith.constant 0 : i32
    return %arg0, %c0_i32 : i32, i32
  }
  func.func @transform_1(%arg0: i32) -> (i32, i32) {
    %c0_i32 = arith.constant 0 : i32
    %c0_i32_0 = arith.constant 0 : i32
    return %arg0, %c0_i32 : i32, i32
  }
  func.func @transform_2(%arg0: i32) -> (i32, i32) {
    %c0_i32 = arith.constant 0 : i32
    %c0_i32_0 = arith.constant 0 : i32
    %c0_i32_1 = arith.constant 0 : i32
    return %c0_i32, %c0_i32_0 : i32, i32
  }
  func.func @transform_3(%arg0: i32) -> (i32, i32) {
    %c0_i32 = arith.constant 0 : i32
    %c0_i32_0 = arith.constant 0 : i32
    %c0_i32_1 = arith.constant 0 : i32
    return %c0_i32, %c0_i32_0 : i32, i32
  }
  func.func @transform_4(%arg0: i32) -> (i32, i32, i32) {
    %c0_i32 = arith.constant 0 : i32
    %c0_i32_0 = arith.constant 0 : i32
    %c0_i32_1 = arith.constant 0 : i32
    %c0_i32_2 = arith.constant 0 : i32
    return %c0_i32, %c0_i32_0, %c0_i32_1 : i32, i32, i32
  }
  func.func @transform_5(%arg0: i32) -> (i32, i32, i32) {
    %c0_i32 = arith.constant 0 : i32
    %c0_i32_0 = arith.constant 0 : i32
    %c0_i32_1 = arith.constant 0 : i32
    %c0_i32_2 = arith.constant 0 : i32
    return %c0_i32, %c0_i32_0, %c0_i32_1 : i32, i32, i32
  }
  func.func @transform_6(%arg0: i32) -> (i32, i32) {
    %c0_i32 = arith.constant 0 : i32
    %c0_i32_0 = arith.constant 0 : i32
    %c0_i32_1 = arith.constant 0 : i32
    return %c0_i32, %c0_i32_0 : i32, i32
  }
  func.func @transform_7(%arg0: i32) -> (i32, i32) {
    %c0_i32 = arith.constant 0 : i32
    %c0_i32_0 = arith.constant 0 : i32
    %c0_i32_1 = arith.constant 0 : i32
    return %c0_i32, %c0_i32_0 : i32, i32
  }
  func.func @transform_8(%arg0: i32) -> (i32, i32) {
    %c0_i32 = arith.constant 0 : i32
    %c0_i32_0 = arith.constant 0 : i32
    %c0_i32_1 = arith.constant 0 : i32
    return %c0_i32, %c0_i32_0 : i32, i32
  }
  func.func @transform_9(%arg0: i32) -> (i32, i32) {
    %c0_i32 = arith.constant 0 : i32
    %c0_i32_0 = arith.constant 0 : i32
    %c0_i32_1 = arith.constant 0 : i32
    return %c0_i32, %c0_i32_0 : i32, i32
  }
  func.func @transform_10(%arg0: i32) -> (i32, i32) {
    %c0_i32 = arith.constant 0 : i32
    %c0_i32_0 = arith.constant 0 : i32
    %c0_i32_1 = arith.constant 0 : i32
    return %c0_i32, %c0_i32_0 : i32, i32
  }
  func.func @transform_11(%arg0: i32) -> (i32, i32) {
    %c0_i32 = arith.constant 0 : i32
    %c0_i32_0 = arith.constant 0 : i32
    %c0_i32_1 = arith.constant 0 : i32
    return %c0_i32, %c0_i32_0 : i32, i32
  }
  func.func @transform_12(%arg0: i32) -> (i32, i32) {
    %c0_i32 = arith.constant 0 : i32
    %c0_i32_0 = arith.constant 0 : i32
    return %arg0, %c0_i32 : i32, i32
  }
  func.func @transform_13(%arg0: i32) -> (i32, i32) {
    %c0_i32 = arith.constant 0 : i32
    %c0_i32_0 = arith.constant 0 : i32
    return %arg0, %c0_i32 : i32, i32
  }
}

</mosaic_0001>

<bundles_post_ra>
// kernel: tpu_custom_call.1
= control target key start
LH: loop header
LB: loop body
LE: loop exit
PB: predicated region body
PF: predicated region fallthrough
CT: control target
= control target key end

     0   :  { %s2808_s0 = inlined_call_operand.hbm [shape: bf16[16,128], index: 0, kind: input, shape index: {}]   ;;  %s2809_s1 = inlined_call_operand.hbm [shape: bf16[16,128], index: 1, kind: input, shape index: {}]   ;;  %s2810_s2 = inlined_call_operand.hbm [shape: bf16[128,128], index: 2, kind: input, shape index: {}]   ;;  %s2811_s3 = inlined_call_operand.hbm [shape: f32[1,128], index: 3, kind: input, shape index: {}]   ;;  %s2812_s4 = inlined_call_operand.hbm [shape: bf16[4,128,128], index: 4, kind: input, shape index: {}]   ;;  %s2813_s5 = inlined_call_operand.vmem [shape: f32[4,1,128], index: 5, kind: input, shape index: {}]   ;;  %s2814_s6 = inlined_call_operand.hbm [shape: bf16[128,256], index: 6, kind: input, shape index: {}]   ;;  %s2815_s7 = inlined_call_operand.vmem [shape: f32[1,256], index: 7, kind: input, shape index: {}]   ;;  %s2816_s8 = inlined_call_operand.hbm [shape: bf16[128,128], index: 8, kind: input, shape index: {}]   ;;  %s2817_s9 = inlined_call_operand.vmem [shape: f32[1,128], index: 9, kind: input, shape index: {}]   ;;  %s2818_s10 = inlined_call_operand.hbm [shape: bf16[128,128], index: 10, kind: input, shape index: {}]   ;;  %s2819_s11 = inlined_call_operand.vmem [shape: f32[1,128], index: 11, kind: input, shape index: {}]   ;;  %s2820_s12 = inlined_call_operand.hbm [shape: f32[16,128], index: 12, kind: output, shape index: {0}]   ;;  %s2821_s13 = inlined_call_operand.hbm [shape: f32[16,256], index: 13, kind: output, shape index: {1}]  }
   0x1   :  { %2832 = sst [smem:[#allocation32_spill]] %s2810_s2 }
   0x2   :  { %2833 = sst [smem:[#allocation33_spill]] %s2811_s3 }
   0x3   :  { %2834 = sst [smem:[#allocation34_spill]] %s2812_s4 }
   0x4   :  { %2835 = sst [smem:[#allocation35_spill]] %s2814_s6 }
   0x5   :  { %2836 = sst [smem:[#allocation36_spill]] %s2816_s8 }
   0x6   :  { %2837 = sst [smem:[#allocation37_spill]] %s2818_s10 }
   0x7   :  { %2838 = sst [smem:[#allocation38_spill]] %s2820_s12 }
   0x8   :  { %19 = vsyncpa [#allocation3], 0 }
   0x9   :  { %21 = vsyncpa [#allocation3 + $0x1], 0 }
   0xa   :  { %22 = vsyncpa [#allocation6], 0 }
   0xb   :  { %24 = vsyncpa [#allocation6 + $0x1], 0 }
   0xc   :  { %25 = vsyncpa [#allocation9], 0 }
   0xd   :  { %26 = vsyncpa [#allocation12], 0 }
   0xe   :  { %27 = vsyncpa [#allocation15], 0 }
   0xf   :  { %28 = vsyncpa [#allocation4], 0 }
  0x10   :  { %30 = vsyncpa [#allocation4 + $0x1], 0 }
  0x11   :  { %31 = vsyncpa [#allocation18], 0 }
  0x12   :  { %33 = vsyncpa [#allocation18 + $0x1], 0  ;;  %s2535_s25 = smov 0   ;;  %s2537_s26 = smov 0  }
  0x13   :  { %s2539_s27 = smov 0   ;;  %s2541_s28 = smov 0  }
  0x14 LB: > { %2839 = sst [smem:[#allocation27_spill]] %s2449_s27  ;;  %s2559_s15 = sadd.s32 4294967295, %s2453_s28   ;;  %s2453_s28 = sphi %s2541_s28, %s2863_s28   ;;  %s2449_s27 = sphi %s2539_s27, %s2865_s27   ;;  %s2445_s26 = sphi %s2537_s26, %s2867_s26   ;;  %s2441_s25 = sphi %s2535_s25, %s2866_s25  }
  0x15   : > { %2840 = sst [smem:[#allocation28_spill]] %s2453_s28  ;;  %p1567_p0 = scmp.ge.s32.totalorder %s2453_s28, 1 }
  0x16   : > { %s2841_s2 = sld [smem:[#allocation32_spill]]  ;;  %p60_p1 = scmp.eq.s32.totalorder %s2559_s15, 0 }
  0x17   : > { %p358_p2 = scmp.lt.s32.totalorder %s2453_s28, 3  ;;  %s2455_s17 = smov [#allocation7]  }
  0x18   : > { %s371_s18 = sshll.u32 %s2455_s17, 4  ;;  %s2843_s3 = sld [smem:[#allocation33_spill]]  ;;  %s372_s18 = int_to_ptr.vmem [resolvable:$true] %s371_s18 }
  0x19   : > { %p2564_p3 = pnand %p1567_p0, %p358_p2  ;;  %s2845_s6 = sld [smem:[#allocation35_spill]] }
  0x1a   : > { %s2456_s30 = smov [#allocation8]   ;;  %s2825_s12 = smov 4  }
  0x1b   : > { %p1993_p4 = pneg %p2564_p3  ;;  %s386_s17 = sshll.u32 %s2456_s30, 4  ;;  %s387_s17 = int_to_ptr.vmem [resolvable:$true] %s386_s17 }
  0x1c   : > { %s369_s14 = sshll.u32 %s2841_s2, 4  ;;  %s2823_s2 = smov 64   ;;  %s370_s14 = int_to_ptr.hbm [resolvable:$true] %s369_s14 }
  0x1d   : > { %p2576_p6 = pnand %p1993_p4, %p60_p1  ;;  %s2459_s19 = smov [#allocation11]  }
  0x1e   : > { %s384_s21 = sshll.u32 %s2843_s3, 4  ;;  %s414_s20 = sshll.u32 %s2459_s19, 4  ;;  %s385_s21 = int_to_ptr.hbm [resolvable:$true] %s384_s21  ;;  %s415_s20 = int_to_ptr.vmem [resolvable:$true] %s414_s20 }
  0x1f   : > { %s412_s29 = sshll.u32 %s2845_s6, 4  ;;  %s2846_s4 = sld [smem:[#allocation34_spill]]  ;;  %s413_s29 = int_to_ptr.hbm [resolvable:$true] %s412_s29 }
  0x20   : > { %1996 = dma.hbm_to_vmem [thread:$0]  (!%p2576_p6), %s370_s14, 1024, %s372_s18, [#allocation6], %s2823_s2, %s2823_s2, %s2825_s12  }
  0x21   : > { %1999 = dma.hbm_to_vmem [thread:$0]  (!%p2576_p6), %s385_s21, 16, %s387_s17, [#allocation9]  }
  0x22   : > { %s2460_s30 = smov 128   ;;  %s2461_s6 = smov 8  }
  0x23   : > { %2005 = dma.hbm_to_vmem [thread:$0]  (!%p2576_p6), %s413_s29, 2048, %s415_s20, [#allocation12], %s2460_s30, %s2460_s30, %s2461_s6  }
  0x24   : > { %s2462_s14 = smov [#allocation10]   ;;  %s2847_s8 = sld [smem:[#allocation36_spill]] }
  0x25   : > { %s395_s3 = sshll.u32 %s2846_s4, 4  ;;  %s397_s18 = sshll.u32 %s2462_s14, 4  ;;  %s396_s3 = int_to_ptr.hbm [resolvable:$true] %s395_s3  ;;  %s398_s18 = int_to_ptr.vmem [resolvable:$true] %s397_s18 }
  0x26   : > { %s2848_s17 = smov 4   ;;  %s2849_s19 = smov 64  }
  0x27   : > { %2002 = dma.hbm_to_vmem [thread:$0]  (!%p2576_p6), %s396_s3, 4096, %s398_s18, [#allocation9], %s2849_s19, %s2849_s19, %s2848_s17  }
  0x28   : > { %s2850_s10 = sld [smem:[#allocation37_spill]]  ;;  %s2463_s23 = smov [#allocation13]  }
  0x29   : > { %s431_s2 = sshll.u32 %s2463_s23, 4  ;;  %s2464_s3 = smov [#allocation14]   ;;  %s432_s2 = int_to_ptr.vmem [resolvable:$true] %s431_s2 }
  0x2a   : > { %s429_s21 = sshll.u32 %s2847_s8, 4  ;;  %s448_s12 = sshll.u32 %s2464_s3, 4  ;;  %s430_s21 = int_to_ptr.hbm [resolvable:$true] %s429_s21  ;;  %s449_s12 = int_to_ptr.vmem [resolvable:$true] %s448_s12 }
  0x2b   : > { %2008 = dma.hbm_to_vmem [thread:$0]  (!%p2576_p6), %s430_s21, 1024, %s432_s2, [#allocation12], %s2849_s19, %s2849_s19, %s2848_s17  }
  0x2c   : > { %s1566_s24 = sadd.s32 4294967294, %s2453_s28   ;;  %s2618_s30 = sadd.s32 1, %s2453_s28  }
  0x2d   : > { %2851 = sst [smem:[#allocation29_spill]] %s2618_s30  ;;  %s43_s14 = ssub.s32 %s2453_s28, %s2618_s30 }
  0x2e   : > { %s446_s20 = sshll.u32 %s2850_s10, 4  ;;  %s46_s18 = sadd.s32 1, %s2449_s27  ;;  %s447_s20 = int_to_ptr.hbm [resolvable:$true] %s446_s20 }
  0x2f   : > { %2011 = dma.hbm_to_vmem [thread:$0]  (!%p2576_p6), %s447_s20, 1024, %s449_s12, [#allocation15], %s2849_s19, %s2849_s19, %s2848_s17  }
  0x30   : > { %p44_p7 = scmp.eq.s32.totalorder %s43_s14, 0  ;;  %p53_p8 = scmp.ne.s32.totalorder %s2449_s27, %s2445_s26 }
  0x31   : > { %p54_p9 = scmp.eq.s32.totalorder %s2453_s28, 0  ;;  %p59_p10 = scmp.ne.s32.totalorder %s2445_s26, %s2441_s25 }
  0x32   : > { %s2629_s21 = scalar_select %p44_p7, %s2449_s27, %s46_s18  }
  0x33   : > { %p2631_p11 = por %p54_p9, %p53_p8  ;;  %p2637_p12 = por %p60_p1, %p59_p10 }
  0x34   : > { %2852 = sst [smem:[#allocation30_spill]] %s2629_s21  ;;  %p319_p13 = scmp.eq.s32.totalorder %s2559_s15, 1 }
  0x35   : > { %p325_p0 = scmp.eq.s32.totalorder %s1566_s24, 1  ;;  %p2032_p2 = scmp.lt.s32.totalorder %s2453_s28, 2 }
  0x36   : > { %s465_s19 = sand.u32 1, %s2449_s27   ;;  %p2644_p4 = por %p319_p13, %p53_p8 }
  0x37   : > { %p2648_p6 = por %p325_p0, %p59_p10  ;;  %s2652_s20 = sshll.u32 %s465_s19, 2 }
  0x38   : > { %s1576_s23 = sshll.u32 %s2453_s28, 2  ;;  %s469_s14 = scalar_lea.vmem [#allocation2], %s2652_s20 }
  0x39   : > { %s2856_s29 = scalar_select %p2648_p6, 1, 0 }
  0x3a   : > { %s473_s12 = scalar_lea.hbm %s2808_s0, %s1576_s23  ;;  %s477_s24 = sshll.u32 %s469_s14, 4  ;;  %s478_s24 = int_to_ptr.vmem [resolvable:$true] %s477_s24 }
  0x3b   : > { %2857 = sst [smem:[#allocation31_spill]] %s2856_s29  ;;  %s475_s18 = sshll.u32 %s473_s12, 4  ;;  %s476_s18 = int_to_ptr.hbm [resolvable:$true] %s475_s18 }
  0x3c   : > { %p2661_p7 = pnand %p2032_p2, %p2631_p11  ;;  %s492_s21 = scalar_lea.hbm %s2809_s1, %s1576_s23 }
  0x3d   : > { %s484_s27 = sand.u32 1, %s2453_s28   ;;  %s466_s30 = scalar_lea.sflag [#allocation3], %s465_s19 }
  0x3e   : > { %s2275_s2 = sshra.s32 %s476_s18, 4  ;;  %p2279_p9 = pneg %p2661_p7  ;;  %s2276_s2 = int_to_ptr.hbm [resolvable:$true] %s2275_s2 }
  0x3f   : > { %s2277_s3 = scalar_lea.hbm %s2276_s2, 4  ;;  %s2282_s14 = scalar_lea.hbm %s2808_s0, 8 }
  0x40   : > { %p2278_p8 = scmp.ne.s32.totalorder %s2276_s2, %s2277_s3  ;;  %p2283_p13 = scmp.lt.s32.totalorder %s2276_s2, %s2808_s0 }
  0x41   : > { %p2284_p0 = scmp.lt.s32.totalorder %s2282_s14, %s2277_s3 }
  0x42   : > { %p2280_p10 = pnand %p2279_p9, %p2278_p8 }
  0x43   : > { %p2285_p2 = por %p2284_p0, %p2283_p13 }
  0x44   : > { %p2281_p11 = pneg %p2280_p10 }
  0x46   : > { %p2286_p5 = pnand %p2285_p2, %p2281_p11 }
  0x48   : > { %2289 = shalt.err (!%p2286_p5)
}
  0x49   : > { %2015 = dma.hbm_to_vmem [thread:$0]  (!%p2661_p7), %s476_s18, 64, %s478_s24, %s466_s30  }
  0x4a   : > { %s494_s19 = sshll.u32 %s492_s21, 4  ;;  %s488_s23 = scalar_lea.vmem [#allocation5], %s2652_s20  ;;  %s495_s19 = int_to_ptr.hbm [resolvable:$true] %s494_s19 }
  0x4b   : > { %s496_s28 = sshll.u32 %s488_s23, 4  ;;  %s485_s22 = scalar_lea.sflag [#allocation6], %s484_s27  ;;  %s497_s28 = int_to_ptr.vmem [resolvable:$true] %s496_s28 }
  0x4c   : > { %s2305_s12 = sshra.s32 %s495_s19, 4  ;;  %s2312_s14 = scalar_lea.hbm %s2809_s1, 8  ;;  %s2306_s12 = int_to_ptr.hbm [resolvable:$true] %s2305_s12 }
  0x4d   : > { %s2307_s29 = scalar_lea.hbm %s2306_s12, 4  ;;  %p2313_p5 = scmp.lt.s32.totalorder %s2306_s12, %s2809_s1 }
  0x4e   : > { %p2308_p8 = scmp.ne.s32.totalorder %s2306_s12, %s2307_s29  ;;  %p2314_p13 = scmp.lt.s32.totalorder %s2312_s14, %s2307_s29 }
  0x50   : > { %p2310_p10 = pnand %p2308_p8, %p2279_p9  ;;  %p2315_p0 = por %p2314_p13, %p2313_p5 }
  0x52   : > { %p2311_p11 = pneg %p2310_p10 }
  0x54   : > { %p2316_p2 = pnand %p2315_p0, %p2311_p11 }
  0x56   : > { %2319 = shalt.err (!%p2316_p2)
}
  0x57   : > { %2018 = dma.hbm_to_vmem [thread:$0]  (!%p2661_p7), %s495_s19, 64, %s497_s28, %s485_s22  }
  0x58   : > { %505 = sbr.rel (%p2564_p3) target bundleno = 1249 (0x4e1), region = 68  ;;  %s2697_s27 = sand.u32 (!%p2564_p3), 1, %s2445_s26  }
  0x59   : > { %s1580_s21 = sshll.u32 (!%p2564_p3), %s2697_s27, 2  ;;  %s508_s20 = scalar_lea.sflag (!%p2564_p3), [#allocation3], %s2697_s27 }
  0x5a   : > { %s2701_s24 = scalar_lea.vmem (!%p2564_p3), [#allocation2], %s1580_s21 }
  0x5d   : > { %2408 = dma.done.wait (%p2637_p12), %s508_s20, 64  }
  0x5e   : > { %2410 = vsyncadd (%p2637_p12), %s508_s20, 4294967232  ;;  %s517_s4 = sand.u32 1, %s2559_s15   ;;  %s2708_s16 = scalar_lea.vmem [#allocation5], %s1580_s21 }
  0x5f   : > { %s518_s28 = scalar_lea.sflag [#allocation6], %s517_s4 }
  0x60   : > { %2412 = dma.done.wait (%p2637_p12), %s518_s28, 64  }
  0x61   : > { %2414 = vsyncadd (%p2637_p12), %s518_s28, 4294967232 }
  0x62   : > { %2416 = dma.done.wait (%p60_p1), [#allocation6], 1024  }
  0x63   : > { %2418 = vsyncadd (%p60_p1), [#allocation6], 4294966272 }
  0x64   : > { %2420 = dma.done.wait (%p60_p1), [#allocation9], 4112  }
  0x65   : > { %2422 = vsyncadd (%p60_p1), [#allocation9], 4294963184 }
  0x66   : > { %2424 = dma.done.wait (%p60_p1), [#allocation12], 3072  }
  0x67   : > { %2426 = vsyncadd (%p60_p1), [#allocation12], 4294964224 }
  0x68   : > { %2428 = dma.done.wait (%p60_p1), [#allocation15], 1024  }
  0x69   : > { %2430 = vsyncadd (%p60_p1), [#allocation15], 4294966272  ;;  %v1895_v0 = vld [vmem:[#allocation7 + $0x38] sm:$0xff]  ;;  %v1894_v1 = vld [vmem:[#allocation7 + $0x30] sm:$0xff]  ;;  %s1589_s22 = sshll.u32 %s2697_s27, 4  ;;  %s1960_s20 = sshll.u32 %s2559_s15, 4 }
  0x6a   : > { %674 = vmatpush.bf16.msra.mxu0 %v1895_v0  ;;  %v1903_v2 = vld [vmem:[#allocation10 + $0x38] sm:$0xff]  ;;  %v1893_v3 = vld [vmem:[#allocation7 + $0x28] sm:$0xff]  ;;  %v1902_v4 = vld [vmem:[#allocation10 + $0x30] sm:$0xff]  ;;  %s2741_s12 = scalar_lea.vmem [#allocation17], %s1589_s22  ;;  %s1378_s28 = scalar_lea.hbm %s2821_s13, %s1960_s20 }
  0x6b   : > { %756 = vmatpush.bf16.msra.mxu1 %v1903_v2  ;;  %v1901_v5 = vld [vmem:[#allocation10 + $0x28] sm:$0xff]  ;;  %v1892_v6 = vld [vmem:[#allocation7 + $0x20] sm:$0xff]  ;;  %v1891_v8 = vld [vmem:[#allocation7 + $0x18] sm:$0xff]  ;;  %s1382_s17 = sshll.u32 %s1378_s28, 4  ;;  %s1353_s29 = scalar_lea.sflag [#allocation18], %s2697_s27  ;;  %s1383_s17 = int_to_ptr.hbm [resolvable:$true] %s1382_s17 }
  0x6c   : > { %v1900_v7 = vld [vmem:[#allocation10 + $0x20] sm:$0xff]  ;;  %v1899_v9 = vld [vmem:[#allocation10 + $0x18] sm:$0xff]  ;;  %v1890_v10 = vld [vmem:[#allocation7 + $0x10] sm:$0xff]  ;;  %s2349_s18 = sshra.s32 %s1383_s17, 4  ;;  %s2355_s22 = scalar_lea.hbm %s2821_s13, 32  ;;  %s2350_s18 = int_to_ptr.hbm [resolvable:$true] %s2349_s18 }
  0x6d   : > { %v1898_v11 = vld [vmem:[#allocation10 + $0x10] sm:$0xff]  ;;  %v1889_v12 = vld [vmem:[#allocation7 + $0x8] sm:$0xff]  ;;  %v1888_v14 = vld [vmem:[#allocation7] sm:$0xff]  ;;  %s2351_s10 = scalar_lea.hbm %s2350_s18, 16  ;;  %p2356_p7 = scmp.lt.s32.totalorder %s2350_s18, %s2821_s13 }
  0x6e   : > { %675 = vmatpush.bf16.msra.mxu0 %v1894_v1  ;;  %v1897_v13 = vld [vmem:[#allocation10 + $0x8] sm:$0xff]  ;;  %v1896_v16 = vld [vmem:[#allocation10] sm:$0xff]  ;;  %v1911_v17 = vld [vmem:[#allocation10 + $0x78] sm:$0xff]  ;;  %p2352_p1 = scmp.ne.s32.totalorder %s2350_s18, %s2351_s10  ;;  %p2357_p9 = scmp.lt.s32.totalorder %s2355_s22, %s2351_s10 }
  0x6f   : > { %757 = vmatpush.bf16.msra.mxu1 %v1902_v4  ;;  %v605_v15 = vld [vmem:[%s2701_s24] sm:$0xf]  ;;  %841 = vmatpush.bf16.msra.mxu2 %v1911_v17  ;;  %v1908_v20 = vld [vmem:[#allocation10 + $0x60] sm:$0xff]  ;;  %v1907_v21 = vld [vmem:[#allocation10 + $0x58] sm:$0xff] }
  0x70   : > { %v1910_v18 = vld [vmem:[#allocation10 + $0x70] sm:$0xff]  ;;  %v1909_v19 = vld [vmem:[#allocation10 + $0x68] sm:$0xff]  ;;  %v2082_v23 = vld [vmem:[#allocation8] ss:$0 sm:$0xff]  ;;  %p2353_p3 = pnand %p2352_p1, %p2644_p4  ;;  %p2358_p8 = por %p2357_p9, %p2356_p7 }
  0x71   : > { %v1906_v22 = vld [vmem:[#allocation10 + $0x50] sm:$0xff]  ;;  %v1905_v28 = vld [vmem:[#allocation10 + $0x48] sm:$0xff]  ;;  %v1904_v29 = vld [vmem:[#allocation10 + $0x40] sm:$0xff] }
  0x72   : > { %676 = vmatpush.bf16.msra.mxu0 %v1893_v3  ;;  %v1745_v30 = vld [vmem:[#allocation11 + $0x70] sm:$0xf]  ;;  %v1927_v31 = vld [vmem:[#allocation11 + $0x74] sm:$0xf0]  ;;  %v1926_v32 = vld [vmem:[#allocation11 + $0x74] sm:$0xf]  ;;  %p2354_p12 = pneg %p2353_p3 }
  0x73   : > { %758 = vmatpush.bf16.msra.mxu1 %v1901_v5  ;;  %842 = vmatpush.bf16.msra.mxu2 %v1910_v18  ;;  %v1746_v33 = vor.u32 %v1927_v31, %v1745_v30  ;;  %v1747_v34 = vld [vmem:[#allocation11 + $0x78] sm:$0xf0]  ;;  %v1737_v35 = vld [vmem:[#allocation11 + $0x60] sm:$0xf]  ;;  %v1925_v36 = vld [vmem:[#allocation11 + $0x64] sm:$0xf0] }
  0x74   : > { %v1750_v37 = vor.u32 %v1926_v32, %v1747_v34  ;;  %v1924_v38 = vld [vmem:[#allocation11 + $0x64] sm:$0xf]  ;;  %v1739_v39 = vld [vmem:[#allocation11 + $0x68] sm:$0xf0]  ;;  %v1738_v40 = vor.u32 %v1925_v36, %v1737_v35  ;;  %v1729_v42 = vld [vmem:[#allocation11 + $0x50] sm:$0xf]  ;;  %p2359_p10 = pnand %p2358_p8, %p2354_p12 }
  0x75   : > { %958 = vmatpush.bf16.msra.mxu3 %v1746_v33  ;;  %v1742_v41 = vor.u32 %v1924_v38, %v1739_v39  ;;  %v1923_v43 = vld [vmem:[#allocation11 + $0x54] sm:$0xf0]  ;;  %v1922_v44 = vld [vmem:[#allocation11 + $0x54] sm:$0xf]  ;;  %v1731_v45 = vld [vmem:[#allocation11 + $0x58] sm:$0xf0] }
  0x76   : > { %677 = vmatpush.bf16.msra.mxu0 %v1892_v6  ;;  %v1730_v46 = vor.u32 %v1923_v43, %v1729_v42  ;;  %v1734_v47 = vor.u32 %v1922_v44, %v1731_v45  ;;  %v1721_v48 = vld [vmem:[#allocation11 + $0x40] sm:$0xf]  ;;  %v1921_v49 = vld [vmem:[#allocation11 + $0x44] sm:$0xf0]  ;;  %v1920_v50 = vld [vmem:[#allocation11 + $0x44] sm:$0xf] }
  0x77   : > { %759 = vmatpush.bf16.msra.mxu1 %v1900_v7  ;;  %843 = vmatpush.bf16.msra.mxu2 %v1909_v19  ;;  %v1723_v51 = vld [vmem:[#allocation11 + $0x48] sm:$0xf0]  ;;  %v1722_v52 = vor.u32 %v1921_v49, %v1721_v48  ;;  %v1713_v54 = vld [vmem:[#allocation11 + $0x30] sm:$0xf]  ;;  %v1919_v55 = vld [vmem:[#allocation11 + $0x34] sm:$0xf0] }
  0x78   : > { %v1726_v53 = vor.u32 %v1920_v50, %v1723_v51  ;;  %v1918_v56 = vld [vmem:[#allocation11 + $0x34] sm:$0xf]  ;;  %v1715_v57 = vld [vmem:[#allocation11 + $0x38] sm:$0xf0]  ;;  %v1714_v58 = vor.u32 %v1919_v55, %v1713_v54  ;;  %v1705_v60 = vld [vmem:[#allocation11 + $0x20] sm:$0xf] }
  0x79   : > { %959 = vmatpush.bf16.msra.mxu3 %v1738_v40  ;;  %v1718_v59 = vor.u32 %v1918_v56, %v1715_v57  ;;  %v1917_v61 = vld [vmem:[#allocation11 + $0x24] sm:$0xf0]  ;;  %v1916_v62 = vld [vmem:[#allocation11 + $0x24] sm:$0xf]  ;;  %v1707_v63 = vld [vmem:[#allocation11 + $0x28] sm:$0xf0] }
  0x7a   : > { %678 = vmatpush.bf16.msra.mxu0 %v1891_v8  ;;  %v1706_v0 = vor.u32 %v1917_v61, %v1705_v60  ;;  %v1710_v1 = vor.u32 %v1916_v62, %v1707_v63  ;;  %v2083_v2 = vld [vmem:[%s2813_s5] ss:$0 sm:$0xff]  ;;  %v1697_v8 = vld [vmem:[#allocation11 + $0x10] sm:$0xf]  ;;  %v1931_v30 = vld [vmem:[#allocation13 + $0x18] sm:$0xff] }
  0x7b   : > { %760 = vmatpush.bf16.msra.mxu1 %v1899_v9  ;;  %844 = vmatpush.bf16.msra.mxu2 %v1908_v20  ;;  %v1915_v9 = vld [vmem:[#allocation11 + $0x14] sm:$0xf0]  ;;  %v1691_v18 = vld [vmem:[#allocation11 + $0x8] sm:$0xf0]  ;;  %v1930_v31 = vld [vmem:[#allocation13 + $0x10] sm:$0xff] }
  0x7c   : > { %v1935_v20 = vld [vmem:[#allocation13 + $0x38] sm:$0xff]  ;;  %v1929_v32 = vld [vmem:[#allocation13 + $0x8] sm:$0xff]  ;;  %v1928_v33 = vld [vmem:[#allocation13] sm:$0xff] }
  0x7d   : > { %960 = vmatpush.bf16.msra.mxu3 %v1730_v46  ;;  %v1943_v34 = vld [vmem:[#allocation10 + $0xb8] sm:$0xff]  ;;  %v1942_v35 = vld [vmem:[#allocation10 + $0xb0] sm:$0xff]  ;;  %v872_v36 = vld [vmem:[%s2815_s7] sm:$0x3] }
  0x7e   : > { %679 = vmatpush.bf16.msra.mxu0 %v1890_v10  ;;  %v1914_v10 = vld [vmem:[#allocation11 + $0x14] sm:$0xf]  ;;  %v875_v38 = vperm.slane %v872_v36, 1  ;;  %v1940_v39 = vld [vmem:[#allocation10 + $0xa0] sm:$0xff]  ;;  %v1939_v42 = vld [vmem:[#allocation10 + $0x98] sm:$0xff]  ;;  %v874_v44 = vperm.slane %v872_v36, 0 }
  0x7f   : > { %761 = vmatpush.bf16.msra.mxu1 %v1898_v11  ;;  %845 = vmatpush.bf16.msra.mxu2 %v1907_v21  ;;  %v1698_v11 = vor.u32 %v1915_v9, %v1697_v8  ;;  %v1934_v21 = vld [vmem:[#allocation13 + $0x30] sm:$0xff]  ;;  %v1949_v61 = vld [vmem:[#allocation10 + $0xe8] sm:$0xff]  ;;  %v1948_v62 = vld [vmem:[#allocation10 + $0xe0] sm:$0xff] }
  0x80   : > { %v986_v49 = vld [vmem:[%s2708_s16] sm:$0xf]  ;;  %s1380_s16 = sshll.u32 %s2741_s12, 4  ;;  %s1381_s16 = int_to_ptr.vmem [resolvable:$true] %s1380_s16 }
  0x81   : > { %961 = vmatpush.bf16.msra.mxu3 %v1722_v52  ;;  %v987_v51 = vunpack.c.l.bf16 %v986_v49  ;;  %v1937_v52 = vld [vmem:[#allocation10 + $0x88] sm:$0xff]  ;;  %v1950_v60 = vld [vmem:[#allocation10 + $0xf0] sm:$0xff]  ;;  %v1947_v63 = vld [vmem:[#allocation10 + $0xd8] sm:$0xff] }
  0x82   : > { %680 = vmatpush.bf16.msra.mxu0 %v1889_v12  ;;  %v1699_v12 = vld [vmem:[#allocation11 + $0x18] sm:$0xf0]  ;;  %v1958_v9 = vld [vmem:[#allocation14 + $0x30] sm:$0xff] }
  0x83   : > { %762 = vmatpush.bf16.msra.mxu1 %v1897_v13  ;;  %846 = vmatpush.bf16.msra.mxu2 %v1906_v22  ;;  %v1702_v13 = vor.u32 %v1914_v10, %v1699_v12  ;;  %v1933_v22 = vld [vmem:[#allocation13 + $0x28] sm:$0xff]  ;;  %v1959_v8 = vld [vmem:[#allocation14 + $0x38] sm:$0xff] }
  0x84   : > { %v1957_v10 = vld [vmem:[#allocation14 + $0x28] sm:$0xff]  ;;  %v1955_v12 = vld [vmem:[#allocation14 + $0x18] sm:$0xff] }
  0x85   : > { %962 = vmatpush.bf16.msra.mxu3 %v1714_v58  ;;  %v1936_v58 = vld [vmem:[#allocation10 + $0x80] sm:$0xff] }
  0x86   : > { %681 = vmatpush.bf16.msra.mxu0 %v1888_v14  ;;  %v1689_v14 = vld [vmem:[#allocation11] sm:$0xf] }
  0x87   : > { %763 = vmatpush.bf16.msra.mxu1 %v1896_v16  ;;  %847 = vmatpush.bf16.msra.mxu2 %v1905_v28  ;;  %v1912_v16 = vld [vmem:[#allocation11 + $0x4] sm:$0xf] }
  0x88   : > { %v1694_v19 = vor.u32 %v1912_v16, %v1691_v18 }
  0x89   : > { %682 = vmatmul.bf16.vlgmr.msra.gmra.mxu0 %v605_v15  ;;  %963 = vmatpush.bf16.msra.mxu3 %v1706_v0  ;;  %v1913_v15 = vld [vmem:[#allocation11 + $0x4] sm:$0xf0]  ;;  %v1946_v0 = vld [vmem:[#allocation10 + $0xd0] sm:$0xff] }
  0x8a   : > { %971 = vmatpush.bf16.msrb.mxu0 %v1750_v37  ;;  %v1690_v17 = vor.u32 %v1913_v15, %v1689_v14  ;;  %v1941_v37 = vld [vmem:[#allocation10 + $0xa8] sm:$0xff]  ;;  %v2086_v14 = vld [vmem:[%s2813_s5 + $0x2] ss:$0 sm:$0xff] }
  0x8b   : > { %848 = vmatpush.bf16.msra.mxu2 %v1904_v29  ;;  %1062 = vmatpush.bf16.msrb.mxu1 %v1935_v20  ;;  %v1932_v29 = vld [vmem:[#allocation13 + $0x20] sm:$0xff]  ;;  %v1953_v20 = vld [vmem:[#allocation14 + $0x8] sm:$0xff] }
  0x8d   : > { %964 = vmatpush.bf16.msra.mxu3 %v1698_v11  ;;  %v1956_v11 = vld [vmem:[#allocation14 + $0x20] sm:$0xff] }
  0x8e   : > { %972 = vmatpush.bf16.msrb.mxu0 %v1742_v41 }
  0x8f   : > { %1063 = vmatpush.bf16.msrb.mxu1 %v1934_v21  ;;  %1146 = vmatpush.bf16.msrb.mxu2 %v1943_v34  ;;  %v1952_v21 = vld [vmem:[#allocation14] sm:$0xff] }
  0x91   : > { %965 = vmatpush.bf16.msra.mxu3 %v1690_v17 }
  0x92   : > { %973 = vmatpush.bf16.msrb.mxu0 %v1734_v47  ;;  %v1938_v47 = vld [vmem:[#allocation10 + $0x90] sm:$0xff] }
  0x93   : > { %1064 = vmatpush.bf16.msrb.mxu1 %v1933_v22  ;;  %1147 = vmatpush.bf16.msrb.mxu2 %v1942_v35  ;;  %v2087_v22 = vld [vmem:[%s2813_s5 + $0x3] ss:$0 sm:$0xff] }
  0x96   : > { %974 = vmatpush.bf16.msrb.mxu0 %v1726_v53 }
  0x97   : > { %1065 = vmatpush.bf16.msrb.mxu1 %v1932_v29  ;;  %1148 = vmatpush.bf16.msrb.mxu2 %v1941_v37 }
  0x9a   : > { %975 = vmatpush.bf16.msrb.mxu0 %v1718_v59  ;;  %v1951_v59 = vld [vmem:[#allocation10 + $0xf8] sm:$0xff] }
  0x9b   : > { %1066 = vmatpush.bf16.msrb.mxu1 %v1931_v30  ;;  %1149 = vmatpush.bf16.msrb.mxu2 %v1940_v39 }
  0x9c   : > { %1231 = vmatpush.bf16.msrb.mxu3 %v1951_v59 }
  0x9e   : > { %976 = vmatpush.bf16.msrb.mxu0 %v1710_v1  ;;  %v2085_v1 = vld [vmem:[%s2817_s9] ss:$0 sm:$0xff] }
  0x9f   : > { %1067 = vmatpush.bf16.msrb.mxu1 %v1930_v31  ;;  %1150 = vmatpush.bf16.msrb.mxu2 %v1939_v42 }
  0xa0   : > { %1232 = vmatpush.bf16.msrb.mxu3 %v1950_v60 }
  0xa2   : > { %977 = vmatpush.bf16.msrb.mxu0 %v1702_v13  ;;  %v1954_v13 = vld [vmem:[#allocation14 + $0x10] sm:$0xff] }
  0xa3   : > { %1068 = vmatpush.bf16.msrb.mxu1 %v1929_v32  ;;  %1151 = vmatpush.bf16.msrb.mxu2 %v1938_v47 }
  0xa4   : > { %1233 = vmatpush.bf16.msrb.mxu3 %v1949_v61 }
  0xa6   : > { %978 = vmatpush.bf16.msrb.mxu0 %v1694_v19 }
  0xa7   : > { %1069 = vmatpush.bf16.msrb.mxu1 %v1928_v33  ;;  %1152 = vmatpush.bf16.msrb.mxu2 %v1937_v52 }
  0xa8   : > { %1234 = vmatpush.bf16.msrb.mxu3 %v1948_v62 }
  0xaa   : > { %1314 = vmatpush.bf16.msra.mxu0 %v1959_v8 }
  0xab   : > { %1153 = vmatpush.bf16.msrb.mxu2 %v1936_v58 }
  0xac   : > { %1235 = vmatpush.bf16.msrb.mxu3 %v1947_v63 }
  0xae   : > { %1315 = vmatpush.bf16.msra.mxu0 %v1958_v9 }
  0xb0   : > { %1236 = vmatpush.bf16.msrb.mxu3 %v1946_v0 }
  0xb2   : > { %1316 = vmatpush.bf16.msra.mxu0 %v1957_v10 }
  0xb6   : > { %1317 = vmatpush.bf16.msra.mxu0 %v1956_v11 }
  0xba   : > { %1318 = vmatpush.bf16.msra.mxu0 %v1955_v12 }
  0xbe   : > { %1319 = vmatpush.bf16.msra.mxu0 %v1954_v13 }
  0xc2   : > { %1320 = vmatpush.bf16.msra.mxu0 %v1953_v20 }
  0xc6   : > { %1321 = vmatpush.bf16.msra.mxu0 %v1952_v21 }
 0x106   : > { %v683_v24 = vpop.f32.mrf.mxu0 }
 0x107   : > { %v684_v25 = vadd.f32 %v2082_v23, %v683_v24  ;;  %v2084_v23 = vld [vmem:[%s2813_s5 + $0x1] ss:$0 sm:$0xff] }
 0x109   : > { %v687_v26 = vpack.c.bf16 %v684_v25, %v684_v25 }
 0x10b   : > { %764 = vmatmul.bf16.vlgmr.msra.gmra.mxu1 %v687_v26 }
 0x10e   : > { %v685_v27 = vpop.f32.mrf.mxu0 }
 0x188   : > { %v765_v3 = vpop.f32.mrf.mxu1 }
 0x189   : > { %v766_v4 = vadd.f32 %v2083_v2, %v765_v3 }
 0x18b   : > { %v769_v5 = vmax.f32 %v766_v4, 0.0 }
 0x18d   : > { %v770_v6 = vpack.c.bf16 %v769_v5, %v769_v5 }
 0x18f   : > { %849 = vmatmul.bf16.vlgmr.msra.gmra.mxu2 %v770_v6  ;;  %v1945_v6 = vld [vmem:[#allocation10 + $0xc8] sm:$0xff] }
 0x190   : > { %v767_v7 = vpop.f32.mrf.mxu1  ;;  %1237 = vmatpush.bf16.msrb.mxu3 %v1945_v6 }
 0x191   : > { %v1944_v7 = vld [vmem:[#allocation10 + $0xc0] sm:$0xff] }
 0x194   : > { %1238 = vmatpush.bf16.msrb.mxu3 %v1944_v7 }
 0x212   : > { %v850_v24 = vpop.f32.mrf.mxu2 }
 0x213   : > { %v851_v25 = vadd.f32 %v2084_v23, %v850_v24 }
 0x215   : > { %v854_v26 = vmax.f32 %v851_v25, 0.0 }
 0x217   : > { %v855_v27 = vpack.c.bf16 %v854_v26, %v854_v26 }
 0x219   : > { %966 = vmatmul.bf16.vlgmr.msra.gmra.mxu3 %v855_v27  ;;  %979 = vmatmul.bf16.vlgmr.msrb.gmra.mxu0 %v855_v27 }
 0x21a   : > { %v852_v28 = vpop.f32.mrf.mxu2 }
 0x296   : > { %v980_v40 = vpop.f32.mrf.mxu0 }
 0x297   : > { %v981_v41 = vadd.f32 %v980_v40, %v875_v38 }
 0x299   : > { %985 = vst [vmem:[%s2741_s12 + $0x8] sm:$0xff] %v981_v41  ;;  %v988_v43 = vmul.f32 0.5, %v981_v41 }
 0x29b   : > { %v989_v45 = vmul.f32 1.442695, %v988_v43 }
 0x29c   : > { %v967_v46 = vpop.f32.mrf.mxu3 }
 0x29d   : > { %2089 = vpow2.f32 %v989_v45  ;;  %v968_v48 = vadd.f32 %v967_v46, %v874_v44 }
 0x29e   : > { %v982_v50 = vpop.f32.mrf.mxu0 }
 0x29f   : > { %984 = vst [vmem:[%s2741_s12] sm:$0xff] %v968_v48 }
 0x2a3   : > { %v2090_v53 = vpop.eup %2089 }
 0x2a4   : > { %v991_v54 = vmul.f32 %v2090_v53, %v987_v51  ;;  %v969_v55 = vpop.f32.mrf.mxu3 }
 0x2a6   : > { %v992_v56 = vadd.f32 %v991_v54, %v968_v48 }
 0x2a8   : > { %v993_v57 = vpack.c.bf16 %v992_v56, %v992_v56 }
 0x2aa   : > { %1070 = vmatmul.bf16.vlgmr.msrb.gmra.mxu1 %v993_v57 }
 0x327   : > { %v1071_v2 = vpop.f32.mrf.mxu1 }
 0x328   : > { %v1072_v3 = vadd.f32 %v2085_v1, %v1071_v2 }
 0x32a   : > { %v1075_v4 = vpack.c.bf16 %v1072_v3, %v1072_v3 }
 0x32c   : > { %1154 = vmatmul.bf16.vlgmr.msrb.gmra.mxu2 %v1075_v4 }
 0x32f   : > { %v1073_v5 = vpop.f32.mrf.mxu1 }
 0x3af   : > { %v1155_v15 = vpop.f32.mrf.mxu2 }
 0x3b0   : > { %v1156_v16 = vadd.f32 %v2086_v14, %v1155_v15 }
 0x3b2   : > { %v1159_v17 = vmax.f32 %v1156_v16, 0.0 }
 0x3b4   : > { %v1160_v18 = vpack.c.bf16 %v1159_v17, %v1159_v17 }
 0x3b6   : > { %1239 = vmatmul.bf16.vlgmr.msrb.gmra.mxu3 %v1160_v18 }
 0x3b7   : > { %v1157_v19 = vpop.f32.mrf.mxu2 }
 0x439   : > { %v1240_v23 = vpop.f32.mrf.mxu3 }
 0x43a   : > { %v1241_v24 = vadd.f32 %v2087_v22, %v1240_v23 }
 0x43c   : > { %v1244_v25 = vmax.f32 %v1241_v24, 0.0 }
 0x43e   : > { %v1245_v26 = vpack.c.bf16 %v1244_v25, %v1244_v25 }
 0x440   : > { %1322 = vmatmul.bf16.vlgmr.msra.gmra.mxu0 %v1245_v26 }
 0x441   : > { %v1242_v27 = vpop.f32.mrf.mxu3 }
 0x442   : > { %2362 = shalt.err (!%p2359_p10)
}
 0x443   : > { %1990 = dma.vmem_to_hbm [thread:$0]  (%p2644_p4), %s1381_s16, 256, %s1383_s17, %s1353_s29   ;;  %v2088_v28 = vld [vmem:[%s2819_s11] ss:$0 sm:$0xff] }
 0x444   : > { %s1588_s8 = sshll.u32 %s2697_s27, 3  ;;  %s1883_s30 = sshll.u32 %s2559_s15, 3 }
 0x445   : > { %s2859_s24 = sld [smem:[#allocation38_spill]]  ;;  %s597_s28 = scalar_lea.vmem [#allocation16], %s1588_s8 }
 0x446   : > { %s1365_s16 = sshll.u32 %s597_s28, 4  ;;  %s1348_s15 = scalar_lea.sflag [#allocation4], %s2697_s27  ;;  %s1366_s16 = int_to_ptr.vmem [resolvable:$true] %s1365_s16 }
 0x44b   : > { %s1363_s4 = scalar_lea.hbm %s2859_s24, %s1883_s30  ;;  %s2383_s23 = scalar_lea.hbm %s2859_s24, 16 }
 0x44c   : > { %s1367_s17 = sshll.u32 %s1363_s4, 4  ;;  %s1368_s17 = int_to_ptr.hbm [resolvable:$true] %s1367_s17 }
 0x44d   : > { %s2377_s29 = sshra.s32 %s1368_s17, 4  ;;  %s2378_s29 = int_to_ptr.hbm [resolvable:$true] %s2377_s29 }
 0x44e   : > { %s2379_s18 = scalar_lea.hbm %s2378_s29, 8  ;;  %p2384_p0 = scmp.lt.s32.totalorder %s2378_s29, %s2859_s24 }
 0x44f   : > { %p2380_p11 = scmp.ne.s32.totalorder %s2378_s29, %s2379_s18  ;;  %p2385_p2 = scmp.lt.s32.totalorder %s2383_s23, %s2379_s18 }
 0x451   : > { %p2381_p5 = pnand %p2380_p11, %p2644_p4  ;;  %p2386_p1 = por %p2385_p2, %p2384_p0 }
 0x453   : > { %p2382_p13 = pneg %p2381_p5 }
 0x455   : > { %p2387_p3 = pnand %p2386_p1, %p2382_p13 }
 0x4bd   : > { %v1323_v29 = vpop.f32.mrf.mxu0 }
 0x4be   : > { %v1324_v30 = vadd.f32 %v2088_v28, %v1323_v29 }
 0x4c0   : > { %v1327_v31 = vsub.f32 0.0, %v1324_v30 }
 0x4c2   : > { %v1328_v32 = vmul.f32 1.442695, %v1327_v31 }
 0x4c4   : > { %2091 = vpow2.f32 %v1328_v32 }
 0x4c5   : > { %v1325_v33 = vpop.f32.mrf.mxu0 }
 0x4ca   : > { %v2092_v34 = vpop.eup %2091 }
 0x4cb   : > { %v1330_v35 = vadd.f32 1.0, %v2092_v34 }
 0x4cd   : > { %2093 = vrcp.f32 %v1330_v35  ;;  %v1342_v39 = vand.u32 2147483648, %v1330_v35  ;;  %v1340_v41 = vand.u32 2147483647, %v1330_v35  ;;  %vm1336_vm1 = vweird.f32 %v1330_v35 }
 0x4cf   : > { %v1343_v43 = vor.u32 1.1754944e-38, %v1342_v39  ;;  %vm1341_vm3 = vcmp.eq.f32.partialorder %v1340_v41, 8.507059e+37 }
 0x4d3   : > { %v2094_v36 = vpop.eup %2093 }
 0x4d4   : > { %v1332_v37 = vmul.f32 %v2094_v36, %v1330_v35  ;;  %vm1337_vm0 = vweird.f32 %v2094_v36 }
 0x4d5   : > { %vm1338_vm2 = vmor %vm1336_vm1, %vm1337_vm0 }
 0x4d6   : > { %v1333_v38 = vsub.f32 1.0, %v1332_v37 }
 0x4d8   : > { %v1334_v40 = vmul.f32 %v2094_v36, %v1333_v38 }
 0x4da   : > { %v1335_v42 = vadd.f32 %v2094_v36, %v1334_v40 }
 0x4dc   : > { %v1339_v44 = vsel %vm1338_vm2, %v2094_v36, %v1335_v42 }
 0x4dd   : > { %v1344_v45 = vsel %vm1341_vm3, %v1343_v43, %v1339_v44 }
 0x4de   : > { %1346 = vst [vmem:[%s597_s28] sm:$0xff] %v1344_v45 }
 0x4df   : > { %2390 = shalt.err (!%p2387_p3)
}
 0x4e0   : > { %1989 = dma.vmem_to_hbm [thread:$0]  (%p2644_p4), %s1366_s16, 128, %s1368_s17, %s1348_s15  }
 0x4e1 PF: > { %s2861_s3 = sld [smem:[#allocation28_spill]]  ;;  %s1394_s12 = sand.u32 1, %s2441_s25  }
 0x4e2   : > { %s1395_s14 = scalar_lea.sflag [#allocation4], %s1394_s12 }
 0x4e7   : > { %p2862_p12 = scmp.ge.s32.totalorder %s2861_s3, 2 }
 0x4e9   : > { %p2020_p7 = pnand %p2862_p12, %p2648_p6 }
 0x4eb   : > { %p2021_p9 = pneg %p2020_p7 }
 0x4ed   : > { %2432 = dma.done.wait (%p2021_p9), %s1395_s14, 128  }
 0x4ee   : > { %2434 = vsyncadd (%p2021_p9), %s1395_s14, 4294967168  ;;  %s1405_s8 = scalar_lea.sflag [#allocation18], %s1394_s12 }
 0x4ef   : > { %2436 = dma.done.wait (%p2021_p9), %s1405_s8, 256  }
 0x4f0   : > { %2438 = vsyncadd (%p2021_p9), %s1405_s8, 4294967040  ;;  %s2863_s28 = sld [smem:[#allocation29_spill]]  ;;  %s2866_s25 = smov %s2445_s26 }
 0x4f1   : > { %s2864_s30 = sld [smem:[#allocation27_spill]] }
 0x4f2   : > { %s2865_s27 = sld [smem:[#allocation30_spill]] }
 0x4f6   : > { %p36_p4 = scmp.ge.s32.totalorder %s2863_s28, 4  }
 0x4f7   : > { %s2867_s26 = smov %s2864_s30 }
 0x4f8   :  { %38 = sbr.rel (!%p36_p4) target bundleno = 20 (0x14), region = 173 }
 0x4fd   :  { %1411 = vsyncpa [#allocation3], 1 }
 0x4fe   :  { %1413 = vsyncpa [#allocation3 + $0x1], 1 }
 0x4ff   :  { %1414 = vsyncpa [#allocation6], 1 }
 0x500   :  { %1416 = vsyncpa [#allocation6 + $0x1], 1 }
 0x501   :  { %1417 = vsyncpa [#allocation9], 1 }
 0x502   :  { %1418 = vsyncpa [#allocation12], 1 }
 0x503   :  { %1419 = vsyncpa [#allocation15], 1 }
 0x504   :  { %1420 = vsyncpa [#allocation4], 1 }
 0x505   :  { %1422 = vsyncpa [#allocation4 + $0x1], 1 }
 0x506   :  { %1423 = vsyncpa [#allocation18], 1 }
 0x507   :  { %1425 = vsyncpa [#allocation18 + $0x1], 1 }

// kernel: tpu_custom_call.1
= control target key start
LH: loop header
LB: loop body
LE: loop exit
PB: predicated region body
PF: predicated region fallthrough
CT: control target
= control target key end

     0   :  { %s2808_s0 = inlined_call_operand.hbm [shape: bf16[16,128], index: 0, kind: input, shape index: {}]   ;;  %s2809_s1 = inlined_call_operand.hbm [shape: bf16[16,128], index: 1, kind: input, shape index: {}]   ;;  %s2810_s2 = inlined_call_operand.hbm [shape: bf16[128,128], index: 2, kind: input, shape index: {}]   ;;  %s2811_s3 = inlined_call_operand.hbm [shape: f32[1,128], index: 3, kind: input, shape index: {}]   ;;  %s2812_s4 = inlined_call_operand.hbm [shape: bf16[4,128,128], index: 4, kind: input, shape index: {}]   ;;  %s2813_s5 = inlined_call_operand.vmem [shape: f32[4,1,128], index: 5, kind: input, shape index: {}]   ;;  %s2814_s6 = inlined_call_operand.hbm [shape: bf16[128,256], index: 6, kind: input, shape index: {}]   ;;  %s2815_s7 = inlined_call_operand.vmem [shape: f32[1,256], index: 7, kind: input, shape index: {}]   ;;  %s2816_s8 = inlined_call_operand.hbm [shape: bf16[128,128], index: 8, kind: input, shape index: {}]   ;;  %s2817_s9 = inlined_call_operand.vmem [shape: f32[1,128], index: 9, kind: input, shape index: {}]   ;;  %s2818_s10 = inlined_call_operand.hbm [shape: bf16[128,128], index: 10, kind: input, shape index: {}]   ;;  %s2819_s11 = inlined_call_operand.vmem [shape: f32[1,128], index: 11, kind: input, shape index: {}]   ;;  %s2820_s12 = inlined_call_operand.hbm [shape: f32[16,128], index: 12, kind: output, shape index: {0}]   ;;  %s2821_s13 = inlined_call_operand.hbm [shape: f32[16,256], index: 13, kind: output, shape index: {1}]  }
   0x1   :  { %2832 = sst [smem:[#allocation32_spill]] %s2810_s2 }
   0x2   :  { %2833 = sst [smem:[#allocation33_spill]] %s2811_s3 }
   0x3   :  { %2834 = sst [smem:[#allocation34_spill]] %s2812_s4 }
   0x4   :  { %2835 = sst [smem:[#allocation35_spill]] %s2814_s6 }
   0x5   :  { %2836 = sst [smem:[#allocation36_spill]] %s2816_s8 }
   0x6   :  { %2837 = sst [smem:[#allocation37_spill]] %s2818_s10 }
   0x7   :  { %2838 = sst [smem:[#allocation38_spill]] %s2820_s12 }
   0x8   :  { %19 = vsyncpa [#allocation3], 0 }
   0x9   :  { %21 = vsyncpa [#allocation3 + $0x1], 0 }
   0xa   :  { %22 = vsyncpa [#allocation6], 0 }
   0xb   :  { %24 = vsyncpa [#allocation6 + $0x1], 0 }
   0xc   :  { %25 = vsyncpa [#allocation9], 0 }
   0xd   :  { %26 = vsyncpa [#allocation12], 0 }
   0xe   :  { %27 = vsyncpa [#allocation15], 0 }
   0xf   :  { %28 = vsyncpa [#allocation4], 0 }
  0x10   :  { %30 = vsyncpa [#allocation4 + $0x1], 0 }
  0x11   :  { %31 = vsyncpa [#allocation18], 0 }
  0x12   :  { %33 = vsyncpa [#allocation18 + $0x1], 0  ;;  %s2535_s25 = smov 0   ;;  %s2537_s26 = smov 0  }
  0x13   :  { %s2539_s27 = smov 0   ;;  %s2541_s28 = smov 0  }
  0x14 LB: > { %2839 = sst [smem:[#allocation27_spill]] %s2449_s27  ;;  %s2559_s15 = sadd.s32 4294967295, %s2453_s28   ;;  %s2453_s28 = sphi %s2541_s28, %s2863_s28   ;;  %s2449_s27 = sphi %s2539_s27, %s2865_s27   ;;  %s2445_s26 = sphi %s2537_s26, %s2867_s26   ;;  %s2441_s25 = sphi %s2535_s25, %s2866_s25  }
  0x15   : > { %2840 = sst [smem:[#allocation28_spill]] %s2453_s28  ;;  %p1567_p0 = scmp.ge.s32.totalorder %s2453_s28, 1 }
  0x16   : > { %s2841_s2 = sld [smem:[#allocation32_spill]]  ;;  %p60_p1 = scmp.eq.s32.totalorder %s2559_s15, 0 }
  0x17   : > { %p358_p2 = scmp.lt.s32.totalorder %s2453_s28, 3  ;;  %s2455_s17 = smov [#allocation7]  }
  0x18   : > { %s371_s18 = sshll.u32 %s2455_s17, 4  ;;  %s2843_s3 = sld [smem:[#allocation33_spill]]  ;;  %s372_s18 = int_to_ptr.vmem [resolvable:$true] %s371_s18 }
  0x19   : > { %p2564_p3 = pnand %p1567_p0, %p358_p2  ;;  %s2845_s6 = sld [smem:[#allocation35_spill]] }
  0x1a   : > { %s2456_s30 = smov [#allocation8]   ;;  %s2825_s12 = smov 4  }
  0x1b   : > { %p1993_p4 = pneg %p2564_p3  ;;  %s386_s17 = sshll.u32 %s2456_s30, 4  ;;  %s387_s17 = int_to_ptr.vmem [resolvable:$true] %s386_s17 }
  0x1c   : > { %s369_s14 = sshll.u32 %s2841_s2, 4  ;;  %s2823_s2 = smov 64   ;;  %s370_s14 = int_to_ptr.hbm [resolvable:$true] %s369_s14 }
  0x1d   : > { %p2576_p6 = pnand %p1993_p4, %p60_p1  ;;  %s2459_s19 = smov [#allocation11]  }
  0x1e   : > { %s384_s21 = sshll.u32 %s2843_s3, 4  ;;  %s414_s20 = sshll.u32 %s2459_s19, 4  ;;  %s385_s21 = int_to_ptr.hbm [resolvable:$true] %s384_s21  ;;  %s415_s20 = int_to_ptr.vmem [resolvable:$true] %s414_s20 }
  0x1f   : > { %s412_s29 = sshll.u32 %s2845_s6, 4  ;;  %s2846_s4 = sld [smem:[#allocation34_spill]]  ;;  %s413_s29 = int_to_ptr.hbm [resolvable:$true] %s412_s29 }
  0x20   : > { %1996 = dma.hbm_to_vmem [thread:$0]  (!%p2576_p6), %s370_s14, 1024, %s372_s18, [#allocation6], %s2823_s2, %s2823_s2, %s2825_s12  }
  0x21   : > { %1999 = dma.hbm_to_vmem [thread:$0]  (!%p2576_p6), %s385_s21, 16, %s387_s17, [#allocation9]  }
  0x22   : > { %s2460_s30 = smov 128   ;;  %s2461_s6 = smov 8  }
  0x23   : > { %2005 = dma.hbm_to_vmem [thread:$0]  (!%p2576_p6), %s413_s29, 2048, %s415_s20, [#allocation12], %s2460_s30, %s2460_s30, %s2461_s6  }
  0x24   : > { %s2462_s14 = smov [#allocation10]   ;;  %s2847_s8 = sld [smem:[#allocation36_spill]] }
  0x25   : > { %s395_s3 = sshll.u32 %s2846_s4, 4  ;;  %s397_s18 = sshll.u32 %s2462_s14, 4  ;;  %s396_s3 = int_to_ptr.hbm [resolvable:$true] %s395_s3  ;;  %s398_s18 = int_to_ptr.vmem [resolvable:$true] %s397_s18 }
  0x26   : > { %s2848_s17 = smov 4   ;;  %s2849_s19 = smov 64  }
  0x27   : > { %2002 = dma.hbm_to_vmem [thread:$0]  (!%p2576_p6), %s396_s3, 4096, %s398_s18, [#allocation9], %s2849_s19, %s2849_s19, %s2848_s17  }
  0x28   : > { %s2850_s10 = sld [smem:[#allocation37_spill]]  ;;  %s2463_s23 = smov [#allocation13]  }
  0x29   : > { %s431_s2 = sshll.u32 %s2463_s23, 4  ;;  %s2464_s3 = smov [#allocation14]   ;;  %s432_s2 = int_to_ptr.vmem [resolvable:$true] %s431_s2 }
  0x2a   : > { %s429_s21 = sshll.u32 %s2847_s8, 4  ;;  %s448_s12 = sshll.u32 %s2464_s3, 4  ;;  %s430_s21 = int_to_ptr.hbm [resolvable:$true] %s429_s21  ;;  %s449_s12 = int_to_ptr.vmem [resolvable:$true] %s448_s12 }
  0x2b   : > { %2008 = dma.hbm_to_vmem [thread:$0]  (!%p2576_p6), %s430_s21, 1024, %s432_s2, [#allocation12], %s2849_s19, %s2849_s19, %s2848_s17  }
  0x2c   : > { %s1566_s24 = sadd.s32 4294967294, %s2453_s28   ;;  %s2618_s30 = sadd.s32 1, %s2453_s28  }
  0x2d   : > { %2851 = sst [smem:[#allocation29_spill]] %s2618_s30  ;;  %s43_s14 = ssub.s32 %s2453_s28, %s2618_s30 }
  0x2e   : > { %s446_s20 = sshll.u32 %s2850_s10, 4  ;;  %s46_s18 = sadd.s32 1, %s2449_s27  ;;  %s447_s20 = int_to_ptr.hbm [resolvable:$true] %s446_s20 }
  0x2f   : > { %2011 = dma.hbm_to_vmem [thread:$0]  (!%p2576_p6), %s447_s20, 1024, %s449_s12, [#allocation15], %s2849_s19, %s2849_s19, %s2848_s17  }
  0x30   : > { %p44_p7 = scmp.eq.s32.totalorder %s43_s14, 0  ;;  %p53_p8 = scmp.ne.s32.totalorder %s2449_s27, %s2445_s26 }
  0x31   : > { %p54_p9 = scmp.eq.s32.totalorder %s2453_s28, 0  ;;  %p59_p10 = scmp.ne.s32.totalorder %s2445_s26, %s2441_s25 }
  0x32   : > { %s2629_s21 = scalar_select %p44_p7, %s2449_s27, %s46_s18  }
  0x33   : > { %p2631_p11 = por %p54_p9, %p53_p8  ;;  %p2637_p12 = por %p60_p1, %p59_p10 }
  0x34   : > { %2852 = sst [smem:[#allocation30_spill]] %s2629_s21  ;;  %p319_p13 = scmp.eq.s32.totalorder %s2559_s15, 1 }
  0x35   : > { %p325_p0 = scmp.eq.s32.totalorder %s1566_s24, 1  ;;  %p2032_p2 = scmp.lt.s32.totalorder %s2453_s28, 2 }
  0x36   : > { %s465_s19 = sand.u32 1, %s2449_s27   ;;  %p2644_p4 = por %p319_p13, %p53_p8 }
  0x37   : > { %p2648_p6 = por %p325_p0, %p59_p10  ;;  %s2652_s20 = sshll.u32 %s465_s19, 2 }
  0x38   : > { %s1576_s23 = sshll.u32 %s2453_s28, 2  ;;  %s469_s14 = scalar_lea.vmem [#allocation2], %s2652_s20 }
  0x39   : > { %s2856_s29 = scalar_select %p2648_p6, 1, 0 }
  0x3a   : > { %s473_s12 = scalar_lea.hbm %s2808_s0, %s1576_s23  ;;  %s477_s24 = sshll.u32 %s469_s14, 4  ;;  %s478_s24 = int_to_ptr.vmem [resolvable:$true] %s477_s24 }
  0x3b   : > { %2857 = sst [smem:[#allocation31_spill]] %s2856_s29  ;;  %s475_s18 = sshll.u32 %s473_s12, 4  ;;  %s476_s18 = int_to_ptr.hbm [resolvable:$true] %s475_s18 }
  0x3c   : > { %p2661_p7 = pnand %p2032_p2, %p2631_p11  ;;  %s492_s21 = scalar_lea.hbm %s2809_s1, %s1576_s23 }
  0x3d   : > { %s484_s27 = sand.u32 1, %s2453_s28   ;;  %s466_s30 = scalar_lea.sflag [#allocation3], %s465_s19 }
  0x3e   : > { %s2275_s2 = sshra.s32 %s476_s18, 4  ;;  %p2279_p9 = pneg %p2661_p7  ;;  %s2276_s2 = int_to_ptr.hbm [resolvable:$true] %s2275_s2 }
  0x3f   : > { %s2277_s3 = scalar_lea.hbm %s2276_s2, 4  ;;  %s2282_s14 = scalar_lea.hbm %s2808_s0, 8 }
  0x40   : > { %p2278_p8 = scmp.ne.s32.totalorder %s2276_s2, %s2277_s3  ;;  %p2283_p13 = scmp.lt.s32.totalorder %s2276_s2, %s2808_s0 }
  0x41   : > { %p2284_p0 = scmp.lt.s32.totalorder %s2282_s14, %s2277_s3 }
  0x42   : > { %p2280_p10 = pnand %p2279_p9, %p2278_p8 }
  0x43   : > { %p2285_p2 = por %p2284_p0, %p2283_p13 }
  0x44   : > { %p2281_p11 = pneg %p2280_p10 }
  0x46   : > { %p2286_p5 = pnand %p2285_p2, %p2281_p11 }
  0x48   : > { %2289 = shalt.err (!%p2286_p5)
}
  0x49   : > { %2015 = dma.hbm_to_vmem [thread:$0]  (!%p2661_p7), %s476_s18, 64, %s478_s24, %s466_s30  }
  0x4a   : > { %s494_s19 = sshll.u32 %s492_s21, 4  ;;  %s488_s23 = scalar_lea.vmem [#allocation5], %s2652_s20  ;;  %s495_s19 = int_to_ptr.hbm [resolvable:$true] %s494_s19 }
  0x4b   : > { %s496_s28 = sshll.u32 %s488_s23, 4  ;;  %s485_s22 = scalar_lea.sflag [#allocation6], %s484_s27  ;;  %s497_s28 = int_to_ptr.vmem [resolvable:$true] %s496_s28 }
  0x4c   : > { %s2305_s12 = sshra.s32 %s495_s19, 4  ;;  %s2312_s14 = scalar_lea.hbm %s2809_s1, 8  ;;  %s2306_s12 = int_to_ptr.hbm [resolvable:$true] %s2305_s12 }
  0x4d   : > { %s2307_s29 = scalar_lea.hbm %s2306_s12, 4  ;;  %p2313_p5 = scmp.lt.s32.totalorder %s2306_s12, %s2809_s1 }
  0x4e   : > { %p2308_p8 = scmp.ne.s32.totalorder %s2306_s12, %s2307_s29  ;;  %p2314_p13 = scmp.lt.s32.totalorder %s2312_s14, %s2307_s29 }
  0x50   : > { %p2310_p10 = pnand %p2308_p8, %p2279_p9  ;;  %p2315_p0 = por %p2314_p13, %p2313_p5 }
  0x52   : > { %p2311_p11 = pneg %p2310_p10 }
  0x54   : > { %p2316_p2 = pnand %p2315_p0, %p2311_p11 }
  0x56   : > { %2319 = shalt.err (!%p2316_p2)
}
  0x57   : > { %2018 = dma.hbm_to_vmem [thread:$0]  (!%p2661_p7), %s495_s19, 64, %s497_s28, %s485_s22  }
  0x58   : > { %505 = sbr.rel (%p2564_p3) target bundleno = 1249 (0x4e1), region = 68  ;;  %s2697_s27 = sand.u32 (!%p2564_p3), 1, %s2445_s26  }
  0x59   : > { %s1580_s21 = sshll.u32 (!%p2564_p3), %s2697_s27, 2  ;;  %s508_s20 = scalar_lea.sflag (!%p2564_p3), [#allocation3], %s2697_s27 }
  0x5a   : > { %s2701_s24 = scalar_lea.vmem (!%p2564_p3), [#allocation2], %s1580_s21 }
  0x5d   : > { %2408 = dma.done.wait (%p2637_p12), %s508_s20, 64  }
  0x5e   : > { %2410 = vsyncadd (%p2637_p12), %s508_s20, 4294967232  ;;  %s517_s4 = sand.u32 1, %s2559_s15   ;;  %s2708_s16 = scalar_lea.vmem [#allocation5], %s1580_s21 }
  0x5f   : > { %s518_s28 = scalar_lea.sflag [#allocation6], %s517_s4 }
  0x60   : > { %2412 = dma.done.wait (%p2637_p12), %s518_s28, 64  }
  0x61   : > { %2414 = vsyncadd (%p2637_p12), %s518_s28, 4294967232 }
  0x62   : > { %2416 = dma.done.wait (%p60_p1), [#allocation6], 1024  }
  0x63   : > { %2418 = vsyncadd (%p60_p1), [#allocation6], 4294966272 }
  0x64   : > { %2420 = dma.done.wait (%p60_p1), [#allocation9], 4112  }
  0x65   : > { %2422 = vsyncadd (%p60_p1), [#allocation9], 4294963184 }
  0x66   : > { %2424 = dma.done.wait (%p60_p1), [#allocation12], 3072  }
  0x67   : > { %2426 = vsyncadd (%p60_p1), [#allocation12], 4294964224 }
  0x68   : > { %2428 = dma.done.wait (%p60_p1), [#allocation15], 1024  }
  0x69   : > { %2430 = vsyncadd (%p60_p1), [#allocation15], 4294966272  ;;  %v1895_v0 = vld [vmem:[#allocation7 + $0x38] sm:$0xff]  ;;  %v1894_v1 = vld [vmem:[#allocation7 + $0x30] sm:$0xff]  ;;  %s1589_s22 = sshll.u32 %s2697_s27, 4  ;;  %s1960_s20 = sshll.u32 %s2559_s15, 4 }
  0x6a   : > { %674 = vmatpush.bf16.msra.mxu0 %v1895_v0  ;;  %v1903_v2 = vld [vmem:[#allocation10 + $0x38] sm:$0xff]  ;;  %v1893_v3 = vld [vmem:[#allocation7 + $0x28] sm:$0xff]  ;;  %v1902_v4 = vld [vmem:[#allocation10 + $0x30] sm:$0xff]  ;;  %s2741_s12 = scalar_lea.vmem [#allocation17], %s1589_s22  ;;  %s1378_s28 = scalar_lea.hbm %s2821_s13, %s1960_s20 }
  0x6b   : > { %756 = vmatpush.bf16.msra.mxu1 %v1903_v2  ;;  %v1901_v5 = vld [vmem:[#allocation10 + $0x28] sm:$0xff]  ;;  %v1892_v6 = vld [vmem:[#allocation7 + $0x20] sm:$0xff]  ;;  %v1891_v8 = vld [vmem:[#allocation7 + $0x18] sm:$0xff]  ;;  %s1382_s17 = sshll.u32 %s1378_s28, 4  ;;  %s1353_s29 = scalar_lea.sflag [#allocation18], %s2697_s27  ;;  %s1383_s17 = int_to_ptr.hbm [resolvable:$true] %s1382_s17 }
  0x6c   : > { %v1900_v7 = vld [vmem:[#allocation10 + $0x20] sm:$0xff]  ;;  %v1899_v9 = vld [vmem:[#allocation10 + $0x18] sm:$0xff]  ;;  %v1890_v10 = vld [vmem:[#allocation7 + $0x10] sm:$0xff]  ;;  %s2349_s18 = sshra.s32 %s1383_s17, 4  ;;  %s2355_s22 = scalar_lea.hbm %s2821_s13, 32  ;;  %s2350_s18 = int_to_ptr.hbm [resolvable:$true] %s2349_s18 }
  0x6d   : > { %v1898_v11 = vld [vmem:[#allocation10 + $0x10] sm:$0xff]  ;;  %v1889_v12 = vld [vmem:[#allocation7 + $0x8] sm:$0xff]  ;;  %v1888_v14 = vld [vmem:[#allocation7] sm:$0xff]  ;;  %s2351_s10 = scalar_lea.hbm %s2350_s18, 16  ;;  %p2356_p7 = scmp.lt.s32.totalorder %s2350_s18, %s2821_s13 }
  0x6e   : > { %675 = vmatpush.bf16.msra.mxu0 %v1894_v1  ;;  %v1897_v13 = vld [vmem:[#allocation10 + $0x8] sm:$0xff]  ;;  %v1896_v16 = vld [vmem:[#allocation10] sm:$0xff]  ;;  %v1911_v17 = vld [vmem:[#allocation10 + $0x78] sm:$0xff]  ;;  %p2352_p1 = scmp.ne.s32.totalorder %s2350_s18, %s2351_s10  ;;  %p2357_p9 = scmp.lt.s32.totalorder %s2355_s22, %s2351_s10 }
  0x6f   : > { %757 = vmatpush.bf16.msra.mxu1 %v1902_v4  ;;  %v605_v15 = vld [vmem:[%s2701_s24] sm:$0xf]  ;;  %841 = vmatpush.bf16.msra.mxu2 %v1911_v17  ;;  %v1908_v20 = vld [vmem:[#allocation10 + $0x60] sm:$0xff]  ;;  %v1907_v21 = vld [vmem:[#allocation10 + $0x58] sm:$0xff] }
  0x70   : > { %v1910_v18 = vld [vmem:[#allocation10 + $0x70] sm:$0xff]  ;;  %v1909_v19 = vld [vmem:[#allocation10 + $0x68] sm:$0xff]  ;;  %v2082_v23 = vld [vmem:[#allocation8] ss:$0 sm:$0xff]  ;;  %p2353_p3 = pnand %p2352_p1, %p2644_p4  ;;  %p2358_p8 = por %p2357_p9, %p2356_p7 }
  0x71   : > { %v1906_v22 = vld [vmem:[#allocation10 + $0x50] sm:$0xff]  ;;  %v1905_v28 = vld [vmem:[#allocation10 + $0x48] sm:$0xff]  ;;  %v1904_v29 = vld [vmem:[#allocation10 + $0x40] sm:$0xff] }
  0x72   : > { %676 = vmatpush.bf16.msra.mxu0 %v1893_v3  ;;  %v1745_v30 = vld [vmem:[#allocation11 + $0x70] sm:$0xf]  ;;  %v1927_v31 = vld [vmem:[#allocation11 + $0x74] sm:$0xf0]  ;;  %v1926_v32 = vld [vmem:[#allocation11 + $0x74] sm:$0xf]  ;;  %p2354_p12 = pneg %p2353_p3 }
  0x73   : > { %758 = vmatpush.bf16.msra.mxu1 %v1901_v5  ;;  %842 = vmatpush.bf16.msra.mxu2 %v1910_v18  ;;  %v1746_v33 = vor.u32 %v1927_v31, %v1745_v30  ;;  %v1747_v34 = vld [vmem:[#allocation11 + $0x78] sm:$0xf0]  ;;  %v1737_v35 = vld [vmem:[#allocation11 + $0x60] sm:$0xf]  ;;  %v1925_v36 = vld [vmem:[#allocation11 + $0x64] sm:$0xf0] }
  0x74   : > { %v1750_v37 = vor.u32 %v1926_v32, %v1747_v34  ;;  %v1924_v38 = vld [vmem:[#allocation11 + $0x64] sm:$0xf]  ;;  %v1739_v39 = vld [vmem:[#allocation11 + $0x68] sm:$0xf0]  ;;  %v1738_v40 = vor.u32 %v1925_v36, %v1737_v35  ;;  %v1729_v42 = vld [vmem:[#allocation11 + $0x50] sm:$0xf]  ;;  %p2359_p10 = pnand %p2358_p8, %p2354_p12 }
  0x75   : > { %958 = vmatpush.bf16.msra.mxu3 %v1746_v33  ;;  %v1742_v41 = vor.u32 %v1924_v38, %v1739_v39  ;;  %v1923_v43 = vld [vmem:[#allocation11 + $0x54] sm:$0xf0]  ;;  %v1922_v44 = vld [vmem:[#allocation11 + $0x54] sm:$0xf]  ;;  %v1731_v45 = vld [vmem:[#allocation11 + $0x58] sm:$0xf0] }
  0x76   : > { %677 = vmatpush.bf16.msra.mxu0 %v1892_v6  ;;  %v1730_v46 = vor.u32 %v1923_v43, %v1729_v42  ;;  %v1734_v47 = vor.u32 %v1922_v44, %v1731_v45  ;;  %v1721_v48 = vld [vmem:[#allocation11 + $0x40] sm:$0xf]  ;;  %v1921_v49 = vld [vmem:[#allocation11 + $0x44] sm:$0xf0]  ;;  %v1920_v50 = vld [vmem:[#allocation11 + $0x44] sm:$0xf] }
  0x77   : > { %759 = vmatpush.bf16.msra.mxu1 %v1900_v7  ;;  %843 = vmatpush.bf16.msra.mxu2 %v1909_v19  ;;  %v1723_v51 = vld [vmem:[#allocation11 + $0x48] sm:$0xf0]  ;;  %v1722_v52 = vor.u32 %v1921_v49, %v1721_v48  ;;  %v1713_v54 = vld [vmem:[#allocation11 + $0x30] sm:$0xf]  ;;  %v1919_v55 = vld [vmem:[#allocation11 + $0x34] sm:$0xf0] }
  0x78   : > { %v1726_v53 = vor.u32 %v1920_v50, %v1723_v51  ;;  %v1918_v56 = vld [vmem:[#allocation11 + $0x34] sm:$0xf]  ;;  %v1715_v57 = vld [vmem:[#allocation11 + $0x38] sm:$0xf0]  ;;  %v1714_v58 = vor.u32 %v1919_v55, %v1713_v54  ;;  %v1705_v60 = vld [vmem:[#allocation11 + $0x20] sm:$0xf] }
  0x79   : > { %959 = vmatpush.bf16.msra.mxu3 %v1738_v40  ;;  %v1718_v59 = vor.u32 %v1918_v56, %v1715_v57  ;;  %v1917_v61 = vld [vmem:[#allocation11 + $0x24] sm:$0xf0]  ;;  %v1916_v62 = vld [vmem:[#allocation11 + $0x24] sm:$0xf]  ;;  %v1707_v63 = vld [vmem:[#allocation11 + $0x28] sm:$0xf0] }
  0x7a   : > { %678 = vmatpush.bf16.msra.mxu0 %v1891_v8  ;;  %v1706_v0 = vor.u32 %v1917_v61, %v1705_v60  ;;  %v1710_v1 = vor.u32 %v1916_v62, %v1707_v63  ;;  %v2083_v2 = vld [vmem:[%s2813_s5] ss:$0 sm:$0xff]  ;;  %v1697_v8 = vld [vmem:[#allocation11 + $0x10] sm:$0xf]  ;;  %v1931_v30 = vld [vmem:[#allocation13 + $0x18] sm:$0xff] }
  0x7b   : > { %760 = vmatpush.bf16.msra.mxu1 %v1899_v9  ;;  %844 = vmatpush.bf16.msra.mxu2 %v1908_v20  ;;  %v1915_v9 = vld [vmem:[#allocation11 + $0x14] sm:$0xf0]  ;;  %v1691_v18 = vld [vmem:[#allocation11 + $0x8] sm:$0xf0]  ;;  %v1930_v31 = vld [vmem:[#allocation13 + $0x10] sm:$0xff] }
  0x7c   : > { %v1935_v20 = vld [vmem:[#allocation13 + $0x38] sm:$0xff]  ;;  %v1929_v32 = vld [vmem:[#allocation13 + $0x8] sm:$0xff]  ;;  %v1928_v33 = vld [vmem:[#allocation13] sm:$0xff] }
  0x7d   : > { %960 = vmatpush.bf16.msra.mxu3 %v1730_v46  ;;  %v1943_v34 = vld [vmem:[#allocation10 + $0xb8] sm:$0xff]  ;;  %v1942_v35 = vld [vmem:[#allocation10 + $0xb0] sm:$0xff]  ;;  %v872_v36 = vld [vmem:[%s2815_s7] sm:$0x3] }
  0x7e   : > { %679 = vmatpush.bf16.msra.mxu0 %v1890_v10  ;;  %v1914_v10 = vld [vmem:[#allocation11 + $0x14] sm:$0xf]  ;;  %v875_v38 = vperm.slane %v872_v36, 1  ;;  %v1940_v39 = vld [vmem:[#allocation10 + $0xa0] sm:$0xff]  ;;  %v1939_v42 = vld [vmem:[#allocation10 + $0x98] sm:$0xff]  ;;  %v874_v44 = vperm.slane %v872_v36, 0 }
  0x7f   : > { %761 = vmatpush.bf16.msra.mxu1 %v1898_v11  ;;  %845 = vmatpush.bf16.msra.mxu2 %v1907_v21  ;;  %v1698_v11 = vor.u32 %v1915_v9, %v1697_v8  ;;  %v1934_v21 = vld [vmem:[#allocation13 + $0x30] sm:$0xff]  ;;  %v1949_v61 = vld [vmem:[#allocation10 + $0xe8] sm:$0xff]  ;;  %v1948_v62 = vld [vmem:[#allocation10 + $0xe0] sm:$0xff] }
  0x80   : > { %v986_v49 = vld [vmem:[%s2708_s16] sm:$0xf]  ;;  %s1380_s16 = sshll.u32 %s2741_s12, 4  ;;  %s1381_s16 = int_to_ptr.vmem [resolvable:$true] %s1380_s16 }
  0x81   : > { %961 = vmatpush.bf16.msra.mxu3 %v1722_v52  ;;  %v987_v51 = vunpack.c.l.bf16 %v986_v49  ;;  %v1937_v52 = vld [vmem:[#allocation10 + $0x88] sm:$0xff]  ;;  %v1950_v60 = vld [vmem:[#allocation10 + $0xf0] sm:$0xff]  ;;  %v1947_v63 = vld [vmem:[#allocation10 + $0xd8] sm:$0xff] }
  0x82   : > { %680 = vmatpush.bf16.msra.mxu0 %v1889_v12  ;;  %v1699_v12 = vld [vmem:[#allocation11 + $0x18] sm:$0xf0]  ;;  %v1958_v9 = vld [vmem:[#allocation14 + $0x30] sm:$0xff] }
  0x83   : > { %762 = vmatpush.bf16.msra.mxu1 %v1897_v13  ;;  %846 = vmatpush.bf16.msra.mxu2 %v1906_v22  ;;  %v1702_v13 = vor.u32 %v1914_v10, %v1699_v12  ;;  %v1933_v22 = vld [vmem:[#allocation13 + $0x28] sm:$0xff]  ;;  %v1959_v8 = vld [vmem:[#allocation14 + $0x38] sm:$0xff] }
  0x84   : > { %v1957_v10 = vld [vmem:[#allocation14 + $0x28] sm:$0xff]  ;;  %v1955_v12 = vld [vmem:[#allocation14 + $0x18] sm:$0xff] }
  0x85   : > { %962 = vmatpush.bf16.msra.mxu3 %v1714_v58  ;;  %v1936_v58 = vld [vmem:[#allocation10 + $0x80] sm:$0xff] }
  0x86   : > { %681 = vmatpush.bf16.msra.mxu0 %v1888_v14  ;;  %v1689_v14 = vld [vmem:[#allocation11] sm:$0xf] }
  0x87   : > { %763 = vmatpush.bf16.msra.mxu1 %v1896_v16  ;;  %847 = vmatpush.bf16.msra.mxu2 %v1905_v28  ;;  %v1912_v16 = vld [vmem:[#allocation11 + $0x4] sm:$0xf] }
  0x88   : > { %v1694_v19 = vor.u32 %v1912_v16, %v1691_v18 }
  0x89   : > { %682 = vmatmul.bf16.vlgmr.msra.gmra.mxu0 %v605_v15  ;;  %963 = vmatpush.bf16.msra.mxu3 %v1706_v0  ;;  %v1913_v15 = vld [vmem:[#allocation11 + $0x4] sm:$0xf0]  ;;  %v1946_v0 = vld [vmem:[#allocation10 + $0xd0] sm:$0xff] }
  0x8a   : > { %971 = vmatpush.bf16.msrb.mxu0 %v1750_v37  ;;  %v1690_v17 = vor.u32 %v1913_v15, %v1689_v14  ;;  %v1941_v37 = vld [vmem:[#allocation10 + $0xa8] sm:$0xff]  ;;  %v2086_v14 = vld [vmem:[%s2813_s5 + $0x2] ss:$0 sm:$0xff] }
  0x8b   : > { %848 = vmatpush.bf16.msra.mxu2 %v1904_v29  ;;  %1062 = vmatpush.bf16.msrb.mxu1 %v1935_v20  ;;  %v1932_v29 = vld [vmem:[#allocation13 + $0x20] sm:$0xff]  ;;  %v1953_v20 = vld [vmem:[#allocation14 + $0x8] sm:$0xff] }
  0x8d   : > { %964 = vmatpush.bf16.msra.mxu3 %v1698_v11  ;;  %v1956_v11 = vld [vmem:[#allocation14 + $0x20] sm:$0xff] }
  0x8e   : > { %972 = vmatpush.bf16.msrb.mxu0 %v1742_v41 }
  0x8f   : > { %1063 = vmatpush.bf16.msrb.mxu1 %v1934_v21  ;;  %1146 = vmatpush.bf16.msrb.mxu2 %v1943_v34  ;;  %v1952_v21 = vld [vmem:[#allocation14] sm:$0xff] }
  0x91   : > { %965 = vmatpush.bf16.msra.mxu3 %v1690_v17 }
  0x92   : > { %973 = vmatpush.bf16.msrb.mxu0 %v1734_v47  ;;  %v1938_v47 = vld [vmem:[#allocation10 + $0x90] sm:$0xff] }
  0x93   : > { %1064 = vmatpush.bf16.msrb.mxu1 %v1933_v22  ;;  %1147 = vmatpush.bf16.msrb.mxu2 %v1942_v35  ;;  %v2087_v22 = vld [vmem:[%s2813_s5 + $0x3] ss:$0 sm:$0xff] }
  0x96   : > { %974 = vmatpush.bf16.msrb.mxu0 %v1726_v53 }
  0x97   : > { %1065 = vmatpush.bf16.msrb.mxu1 %v1932_v29  ;;  %1148 = vmatpush.bf16.msrb.mxu2 %v1941_v37 }
  0x9a   : > { %975 = vmatpush.bf16.msrb.mxu0 %v1718_v59  ;;  %v1951_v59 = vld [vmem:[#allocation10 + $0xf8] sm:$0xff] }
  0x9b   : > { %1066 = vmatpush.bf16.msrb.mxu1 %v1931_v30  ;;  %1149 = vmatpush.bf16.msrb.mxu2 %v1940_v39 }
  0x9c   : > { %1231 = vmatpush.bf16.msrb.mxu3 %v1951_v59 }
  0x9e   : > { %976 = vmatpush.bf16.msrb.mxu0 %v1710_v1  ;;  %v2085_v1 = vld [vmem:[%s2817_s9] ss:$0 sm:$0xff] }
  0x9f   : > { %1067 = vmatpush.bf16.msrb.mxu1 %v1930_v31  ;;  %1150 = vmatpush.bf16.msrb.mxu2 %v1939_v42 }
  0xa0   : > { %1232 = vmatpush.bf16.msrb.mxu3 %v1950_v60 }
  0xa2   : > { %977 = vmatpush.bf16.msrb.mxu0 %v1702_v13  ;;  %v1954_v13 = vld [vmem:[#allocation14 + $0x10] sm:$0xff] }
  0xa3   : > { %1068 = vmatpush.bf16.msrb.mxu1 %v1929_v32  ;;  %1151 = vmatpush.bf16.msrb.mxu2 %v1938_v47 }
  0xa4   : > { %1233 = vmatpush.bf16.msrb.mxu3 %v1949_v61 }
  0xa6   : > { %978 = vmatpush.bf16.msrb.mxu0 %v1694_v19 }
  0xa7   : > { %1069 = vmatpush.bf16.msrb.mxu1 %v1928_v33  ;;  %1152 = vmatpush.bf16.msrb.mxu2 %v1937_v52 }
  0xa8   : > { %1234 = vmatpush.bf16.msrb.mxu3 %v1948_v62 }
  0xaa   : > { %1314 = vmatpush.bf16.msra.mxu0 %v1959_v8 }
  0xab   : > { %1153 = vmatpush.bf16.msrb.mxu2 %v1936_v58 }
  0xac   : > { %1235 = vmatpush.bf16.msrb.mxu3 %v1947_v63 }
  0xae   : > { %1315 = vmatpush.bf16.msra.mxu0 %v1958_v9 }
  0xb0   : > { %1236 = vmatpush.bf16.msrb.mxu3 %v1946_v0 }
  0xb2   : > { %1316 = vmatpush.bf16.msra.mxu0 %v1957_v10 }
  0xb6   : > { %1317 = vmatpush.bf16.msra.mxu0 %v1956_v11 }
  0xba   : > { %1318 = vmatpush.bf16.msra.mxu0 %v1955_v12 }
  0xbe   : > { %1319 = vmatpush.bf16.msra.mxu0 %v1954_v13 }
  0xc2   : > { %1320 = vmatpush.bf16.msra.mxu0 %v1953_v20 }
  0xc6   : > { %1321 = vmatpush.bf16.msra.mxu0 %v1952_v21 }
 0x106   : > { %v683_v24 = vpop.f32.mrf.mxu0 }
 0x107   : > { %v684_v25 = vadd.f32 %v2082_v23, %v683_v24  ;;  %v2084_v23 = vld [vmem:[%s2813_s5 + $0x1] ss:$0 sm:$0xff] }
 0x109   : > { %v687_v26 = vpack.c.bf16 %v684_v25, %v684_v25 }
 0x10b   : > { %764 = vmatmul.bf16.vlgmr.msra.gmra.mxu1 %v687_v26 }
 0x10e   : > { %v685_v27 = vpop.f32.mrf.mxu0 }
 0x188   : > { %v765_v3 = vpop.f32.mrf.mxu1 }
 0x189   : > { %v766_v4 = vadd.f32 %v2083_v2, %v765_v3 }
 0x18b   : > { %v769_v5 = vmax.f32 %v766_v4, 0.0 }
 0x18d   : > { %v770_v6 = vpack.c.bf16 %v769_v5, %v769_v5 }
 0x18f   : > { %849 = vmatmul.bf16.vlgmr.msra.gmra.mxu2 %v770_v6  ;;  %v1945_v6 = vld [vmem:[#allocation10 + $0xc8] sm:$0xff] }
 0x190   : > { %v767_v7 = vpop.f32.mrf.mxu1  ;;  %1237 = vmatpush.bf16.msrb.mxu3 %v1945_v6 }
 0x191   : > { %v1944_v7 = vld [vmem:[#allocation10 + $0xc0] sm:$0xff] }
 0x194   : > { %1238 = vmatpush.bf16.msrb.mxu3 %v1944_v7 }
 0x212   : > { %v850_v24 = vpop.f32.mrf.mxu2 }
 0x213   : > { %v851_v25 = vadd.f32 %v2084_v23, %v850_v24 }
 0x215   : > { %v854_v26 = vmax.f32 %v851_v25, 0.0 }
 0x217   : > { %v855_v27 = vpack.c.bf16 %v854_v26, %v854_v26 }
 0x219   : > { %966 = vmatmul.bf16.vlgmr.msra.gmra.mxu3 %v855_v27  ;;  %979 = vmatmul.bf16.vlgmr.msrb.gmra.mxu0 %v855_v27 }
 0x21a   : > { %v852_v28 = vpop.f32.mrf.mxu2 }
 0x296   : > { %v980_v40 = vpop.f32.mrf.mxu0 }
 0x297   : > { %v981_v41 = vadd.f32 %v980_v40, %v875_v38 }
 0x299   : > { %985 = vst [vmem:[%s2741_s12 + $0x8] sm:$0xff] %v981_v41  ;;  %v988_v43 = vmul.f32 0.5, %v981_v41 }
 0x29b   : > { %v989_v45 = vmul.f32 1.442695, %v988_v43 }
 0x29c   : > { %v967_v46 = vpop.f32.mrf.mxu3 }
 0x29d   : > { %2089 = vpow2.f32 %v989_v45  ;;  %v968_v48 = vadd.f32 %v967_v46, %v874_v44 }
 0x29e   : > { %v982_v50 = vpop.f32.mrf.mxu0 }
 0x29f   : > { %984 = vst [vmem:[%s2741_s12] sm:$0xff] %v968_v48 }
 0x2a3   : > { %v2090_v53 = vpop.eup %2089 }
 0x2a4   : > { %v991_v54 = vmul.f32 %v2090_v53, %v987_v51  ;;  %v969_v55 = vpop.f32.mrf.mxu3 }
 0x2a6   : > { %v992_v56 = vadd.f32 %v991_v54, %v968_v48 }
 0x2a8   : > { %v993_v57 = vpack.c.bf16 %v992_v56, %v992_v56 }
 0x2aa   : > { %1070 = vmatmul.bf16.vlgmr.msrb.gmra.mxu1 %v993_v57 }
 0x327   : > { %v1071_v2 = vpop.f32.mrf.mxu1 }
 0x328   : > { %v1072_v3 = vadd.f32 %v2085_v1, %v1071_v2 }
 0x32a   : > { %v1075_v4 = vpack.c.bf16 %v1072_v3, %v1072_v3 }
 0x32c   : > { %1154 = vmatmul.bf16.vlgmr.msrb.gmra.mxu2 %v1075_v4 }
 0x32f   : > { %v1073_v5 = vpop.f32.mrf.mxu1 }
 0x3af   : > { %v1155_v15 = vpop.f32.mrf.mxu2 }
 0x3b0   : > { %v1156_v16 = vadd.f32 %v2086_v14, %v1155_v15 }
 0x3b2   : > { %v1159_v17 = vmax.f32 %v1156_v16, 0.0 }
 0x3b4   : > { %v1160_v18 = vpack.c.bf16 %v1159_v17, %v1159_v17 }
 0x3b6   : > { %1239 = vmatmul.bf16.vlgmr.msrb.gmra.mxu3 %v1160_v18 }
 0x3b7   : > { %v1157_v19 = vpop.f32.mrf.mxu2 }
 0x439   : > { %v1240_v23 = vpop.f32.mrf.mxu3 }
 0x43a   : > { %v1241_v24 = vadd.f32 %v2087_v22, %v1240_v23 }
 0x43c   : > { %v1244_v25 = vmax.f32 %v1241_v24, 0.0 }
 0x43e   : > { %v1245_v26 = vpack.c.bf16 %v1244_v25, %v1244_v25 }
 0x440   : > { %1322 = vmatmul.bf16.vlgmr.msra.gmra.mxu0 %v1245_v26 }
 0x441   : > { %v1242_v27 = vpop.f32.mrf.mxu3 }
 0x442   : > { %2362 = shalt.err (!%p2359_p10)
}
 0x443   : > { %1990 = dma.vmem_to_hbm [thread:$0]  (%p2644_p4), %s1381_s16, 256, %s1383_s17, %s1353_s29   ;;  %v2088_v28 = vld [vmem:[%s2819_s11] ss:$0 sm:$0xff] }
 0x444   : > { %s1588_s8 = sshll.u32 %s2697_s27, 3  ;;  %s1883_s30 = sshll.u32 %s2559_s15, 3 }
 0x445   : > { %s2859_s24 = sld [smem:[#allocation38_spill]]  ;;  %s597_s28 = scalar_lea.vmem [#allocation16], %s1588_s8 }
 0x446   : > { %s1365_s16 = sshll.u32 %s597_s28, 4  ;;  %s1348_s15 = scalar_lea.sflag [#allocation4], %s2697_s27  ;;  %s1366_s16 = int_to_ptr.vmem [resolvable:$true] %s1365_s16 }
 0x44b   : > { %s1363_s4 = scalar_lea.hbm %s2859_s24, %s1883_s30  ;;  %s2383_s23 = scalar_lea.hbm %s2859_s24, 16 }
 0x44c   : > { %s1367_s17 = sshll.u32 %s1363_s4, 4  ;;  %s1368_s17 = int_to_ptr.hbm [resolvable:$true] %s1367_s17 }
 0x44d   : > { %s2377_s29 = sshra.s32 %s1368_s17, 4  ;;  %s2378_s29 = int_to_ptr.hbm [resolvable:$true] %s2377_s29 }
 0x44e   : > { %s2379_s18 = scalar_lea.hbm %s2378_s29, 8  ;;  %p2384_p0 = scmp.lt.s32.totalorder %s2378_s29, %s2859_s24 }
 0x44f   : > { %p2380_p11 = scmp.ne.s32.totalorder %s2378_s29, %s2379_s18  ;;  %p2385_p2 = scmp.lt.s32.totalorder %s2383_s23, %s2379_s18 }
 0x451   : > { %p2381_p5 = pnand %p2380_p11, %p2644_p4  ;;  %p2386_p1 = por %p2385_p2, %p2384_p0 }
 0x453   : > { %p2382_p13 = pneg %p2381_p5 }
 0x455   : > { %p2387_p3 = pnand %p2386_p1, %p2382_p13 }
 0x4bd   : > { %v1323_v29 = vpop.f32.mrf.mxu0 }
 0x4be   : > { %v1324_v30 = vadd.f32 %v2088_v28, %v1323_v29 }
 0x4c0   : > { %v1327_v31 = vsub.f32 0.0, %v1324_v30 }
 0x4c2   : > { %v1328_v32 = vmul.f32 1.442695, %v1327_v31 }
 0x4c4   : > { %2091 = vpow2.f32 %v1328_v32 }
 0x4c5   : > { %v1325_v33 = vpop.f32.mrf.mxu0 }
 0x4ca   : > { %v2092_v34 = vpop.eup %2091 }
 0x4cb   : > { %v1330_v35 = vadd.f32 1.0, %v2092_v34 }
 0x4cd   : > { %2093 = vrcp.f32 %v1330_v35  ;;  %v1342_v39 = vand.u32 2147483648, %v1330_v35  ;;  %v1340_v41 = vand.u32 2147483647, %v1330_v35  ;;  %vm1336_vm1 = vweird.f32 %v1330_v35 }
 0x4cf   : > { %v1343_v43 = vor.u32 1.1754944e-38, %v1342_v39  ;;  %vm1341_vm3 = vcmp.eq.f32.partialorder %v1340_v41, 8.507059e+37 }
 0x4d3   : > { %v2094_v36 = vpop.eup %2093 }
 0x4d4   : > { %v1332_v37 = vmul.f32 %v2094_v36, %v1330_v35  ;;  %vm1337_vm0 = vweird.f32 %v2094_v36 }
 0x4d5   : > { %vm1338_vm2 = vmor %vm1336_vm1, %vm1337_vm0 }
 0x4d6   : > { %v1333_v38 = vsub.f32 1.0, %v1332_v37 }
 0x4d8   : > { %v1334_v40 = vmul.f32 %v2094_v36, %v1333_v38 }
 0x4da   : > { %v1335_v42 = vadd.f32 %v2094_v36, %v1334_v40 }
 0x4dc   : > { %v1339_v44 = vsel %vm1338_vm2, %v2094_v36, %v1335_v42 }
 0x4dd   : > { %v1344_v45 = vsel %vm1341_vm3, %v1343_v43, %v1339_v44 }
 0x4de   : > { %1346 = vst [vmem:[%s597_s28] sm:$0xff] %v1344_v45 }
 0x4df   : > { %2390 = shalt.err (!%p2387_p3)
}
 0x4e0   : > { %1989 = dma.vmem_to_hbm [thread:$0]  (%p2644_p4), %s1366_s16, 128, %s1368_s17, %s1348_s15  }
 0x4e1 PF: > { %s2861_s3 = sld [smem:[#allocation28_spill]]  ;;  %s1394_s12 = sand.u32 1, %s2441_s25  }
 0x4e2   : > { %s1395_s14 = scalar_lea.sflag [#allocation4], %s1394_s12 }
 0x4e7   : > { %p2862_p12 = scmp.ge.s32.totalorder %s2861_s3, 2 }
 0x4e9   : > { %p2020_p7 = pnand %p2862_p12, %p2648_p6 }
 0x4eb   : > { %p2021_p9 = pneg %p2020_p7 }
 0x4ed   : > { %2432 = dma.done.wait (%p2021_p9), %s1395_s14, 128  }
 0x4ee   : > { %2434 = vsyncadd (%p2021_p9), %s1395_s14, 4294967168  ;;  %s1405_s8 = scalar_lea.sflag [#allocation18], %s1394_s12 }
 0x4ef   : > { %2436 = dma.done.wait (%p2021_p9), %s1405_s8, 256  }
 0x4f0   : > { %2438 = vsyncadd (%p2021_p9), %s1405_s8, 4294967040  ;;  %s2863_s28 = sld [smem:[#allocation29_spill]]  ;;  %s2866_s25 = smov %s2445_s26 }
 0x4f1   : > { %s2864_s30 = sld [smem:[#allocation27_spill]] }
 0x4f2   : > { %s2865_s27 = sld [smem:[#allocation30_spill]] }
 0x4f6   : > { %p36_p4 = scmp.ge.s32.totalorder %s2863_s28, 4  }
 0x4f7   : > { %s2867_s26 = smov %s2864_s30 }
 0x4f8   :  { %38 = sbr.rel (!%p36_p4) target bundleno = 20 (0x14), region = 173 }
 0x4fd   :  { %1411 = vsyncpa [#allocation3], 1 }
 0x4fe   :  { %1413 = vsyncpa [#allocation3 + $0x1], 1 }
 0x4ff   :  { %1414 = vsyncpa [#allocation6], 1 }
 0x500   :  { %1416 = vsyncpa [#allocation6 + $0x1], 1 }
 0x501   :  { %1417 = vsyncpa [#allocation9], 1 }
 0x502   :  { %1418 = vsyncpa [#allocation12], 1 }
 0x503   :  { %1419 = vsyncpa [#allocation15], 1 }
 0x504   :  { %1420 = vsyncpa [#allocation4], 1 }
 0x505   :  { %1422 = vsyncpa [#allocation4 + $0x1], 1 }
 0x506   :  { %1423 = vsyncpa [#allocation18], 1 }
 0x507   :  { %1425 = vsyncpa [#allocation18 + $0x1], 1 }

</bundles_post_ra>
